<compile_context>
chip_gen: v7x
topology: tpu7x:2x2x1
jax: 0.10.0
libtpu: 0.0.40
codegen_flags: <defaults>
</compile_context>

<pallas_src>
import jax
import jax.numpy as jnp
import numpy as np
from jax.experimental import pallas as pl
from jax.experimental.pallas import tpu as pltpu

# ---- static problem sizes (small, TPU-friendly) ----
B         = 2            # batch
F_DIM     = 128          # feature_length (conv channels == linear width)
L_PROT    = 8            # protein seq len
L_MOL     = 8            # molecule seq len
L_SEQ     = L_PROT + L_MOL
ROWS      = B * L_SEQ    # 32 -- batch folded into the matmul M dimension
K         = 7            # conv kernel size (padding = 3)
LAYERS    = 3
CLASSES   = 2
CP        = 128          # classes padded to one lane-width for the output slab
DOWN      = 128          # FC_down output width
FEAT_ROWS = 8            # FC head carried as an (8, 128) slab (sublane-dense)


def lenet_kernel(x_ref, convw_ref, convb_ref, fcw_ref, fcb_ref,
                 w_ref, b_ref, o_ref, x_vmem):
    """One grid step == one residual conv layer.

    x_ref     : (ROWS, F_DIM)       f32   input activations (read at step 0 only)
    convw_ref : (1, K, F_DIM, F_DIM) bf16  this layer's conv weight (pipelined DMA)
    convb_ref : (1, 1, F_DIM)       f32   this layer's conv bias
    fcw_ref   : (LAYERS, F, F)      bf16  FC_comb weights (resident, loaded once)
    fcb_ref   : (LAYERS, 1, F)      f32
    w_ref     : (F_DIM, CP)         f32   fused FC_down @ FC_out
    b_ref     : (1, CP)             f32
    o_ref     : (FEAT_ROWS, CP)     f32   output slab (written at last step)
    x_vmem    : (ROWS, F_DIM)       f32   resident activation carry
    """
    layer = pl.program_id(0)

    @pl.when(layer == 0)
    def _():
        x_vmem[...] = x_ref[...]

    x = x_vmem[...]                                  # (ROWS, F) f32
    x_bf16 = x.astype(jnp.bfloat16)

    # Per-row sequence position -> (ROWS, 1) column masks (broadcast over lanes).
    pos = jax.lax.broadcasted_iota(jnp.int32, (ROWS, 1), 0) % L_SEQ

    # ---- residual Conv1d(k=7, pad=3): 7 tap-decomposed matmuls, f32 accumulation.
    acc = jnp.zeros((ROWS, F_DIM), jnp.float32)
    for k in range(K):
        d = k - K // 2
        if d == 0:
            band = x_bf16
        else:
            # band[r] = x[r + d]  (XLU sublane rotate; the mask zeroes the
            # wrap-around / cross-batch rows -> conv zero padding).
            shifted = pltpu.roll(x, shift=(-d) % ROWS, axis=0)
            mask = (pos + d >= 0) & (pos + d < L_SEQ)
            band = jnp.where(mask, shifted, 0.0).astype(jnp.bfloat16)
        acc = acc + jnp.dot(band, convw_ref[0, k],
                            preferred_element_type=jnp.float32)
    x_new = jnp.maximum(acc + convb_ref[0], 0.0) + x     # ReLU(conv) + residual
    x_vmem[...] = x_new

    # ---- FC head: only on the last layer's grid step ----
    @pl.when(layer == LAYERS - 1)
    def _():
        # mean over the sequence dim (per batch element), padded to FEAT_ROWS rows
        feats = [jnp.sum(x_new[b * L_SEQ:(b + 1) * L_SEQ, :], axis=0, keepdims=True)
                 for b in range(B)]
        feat = jnp.concatenate(
            feats + [jnp.zeros((FEAT_ROWS - B, F_DIM), jnp.float32)],
            axis=0) * (1.0 / L_SEQ)                       # (FEAT_ROWS, F)

        # FC_combs: ReLU(Linear(F, F)) x layers
        for i in range(LAYERS):
            feat = jnp.maximum(
                jnp.dot(feat.astype(jnp.bfloat16), fcw_ref[i],
                        preferred_element_type=jnp.float32) + fcb_ref[i], 0.0)

        # fused FC_down @ FC_out (kept f32: composed linear, tiny matmul)
        o_ref[...] = jnp.dot(feat, w_ref[...],
                             preferred_element_type=jnp.float32) + b_ref[...]


def lenet_forward(x, convw, convb, fcw, fcb, downw, downb, outw, outb):
    """x: (B, L_SEQ, F_DIM) channels-last float32.  Returns (B, CLASSES)."""
    x2 = x.reshape(ROWS, F_DIM)
    convw_b = convw.astype(jnp.bfloat16)          # (LAYERS, K, F_in, F_out)
    fcw_b = fcw.astype(jnp.bfloat16)
    # FC_down and FC_out composed host-side (exact linear-algebra fusion), f32.
    w_fused = downw @ outw                        # (F_DIM, CP)
    b_fused = downb @ outw + outb                 # (1, CP)

    out = pl.pallas_call(
        lenet_kernel,
        out_shape=jax.ShapeDtypeStruct((FEAT_ROWS, CP), jnp.float32),
        grid_spec=pltpu.PrefetchScalarGridSpec(
            num_scalar_prefetch=0,
            grid=(LAYERS,),                       # one grid step per conv layer
            in_specs=[
                # input activations: loaded once (constant block index)
                pl.BlockSpec((ROWS, F_DIM), lambda l: (0, 0)),
                # per-layer conv weight/bias: pipelined DMA (double-buffered)
                pl.BlockSpec((1, K, F_DIM, F_DIM), lambda l: (l, 0, 0, 0)),
                pl.BlockSpec((1, 1, F_DIM), lambda l: (l, 0, 0)),
                # FC head weights: small, resident across all steps
                pl.BlockSpec((LAYERS, F_DIM, F_DIM), lambda l: (0, 0, 0)),
                pl.BlockSpec((LAYERS, 1, F_DIM), lambda l: (0, 0, 0)),
                pl.BlockSpec((F_DIM, CP), lambda l: (0, 0)),
                pl.BlockSpec((1, CP), lambda l: (0, 0)),
            ],
            out_specs=pl.BlockSpec((FEAT_ROWS, CP), lambda l: (0, 0)),
            scratch_shapes=[pltpu.VMEM((ROWS, F_DIM), jnp.float32)],
        ),
        compiler_params=pltpu.CompilerParams(
            dimension_semantics=("arbitrary",)),   # sequential layer carry
    )(x2, convw_b, convb, fcw_b, fcb, w_fused, b_fused)
    return out[:B, :CLASSES]


def lenet_reference(x, convw, convb, fcw, fcb, downw, downb, outw, outb):
    """Pure-JAX reference of the same forward pass (channels-last), mirroring the
    kernel's mixed precision (bf16 matmul operands, f32 accumulation) but with the
    original unfused / pad-and-slice layer structure."""
    convw_b = convw.astype(jnp.bfloat16)
    fcw_b = fcw.astype(jnp.bfloat16)
    h = x
    for i in range(LAYERS):
        xp = jnp.pad(h, ((0, 0), (K // 2, K // 2), (0, 0)))
        acc = jnp.zeros_like(h)
        for k in range(K):
            acc = acc + jnp.einsum(
                'blf,fg->blg',
                xp[:, k:k + L_SEQ, :].astype(jnp.bfloat16), convw_b[i, k],
                preferred_element_type=jnp.float32)
        h = jnp.maximum(acc + convb[i], 0.0) + h
    feat = jnp.mean(h, axis=1)
    for i in range(LAYERS):
        feat = jnp.maximum(
            jnp.dot(feat.astype(jnp.bfloat16), fcw_b[i],
                    preferred_element_type=jnp.float32) + fcb[i], 0.0)
    feat = feat @ downw + downb
    out = feat @ outw + outb
    return out[:, :CLASSES]


if __name__ == "__main__":
    key = jax.random.PRNGKey(0)
    ks = jax.random.split(key, 10)

    proteins  = jax.random.normal(ks[0], (B, L_PROT, F_DIM), jnp.float32) * 0.5
    molecules = jax.random.normal(ks[1], (B, L_MOL, F_DIM), jnp.float32) * 0.5

    # Parameters (deterministic synthetic init, shapes implied by __init__):
    #   Conv1d(F, F, k=7) -> torch weight (F_out, F_in, 7); stored here as
    #   (LAYERS, K, F_in, F_out) so each tap is expressed as band_k @ W[k].
    convw = jax.random.normal(ks[2], (LAYERS, K, F_DIM, F_DIM), jnp.float32) * 0.02
    convb = jax.random.normal(ks[3], (LAYERS, 1, F_DIM), jnp.float32) * 0.02
    fcw   = jax.random.normal(ks[4], (LAYERS, F_DIM, F_DIM), jnp.float32) * 0.05
    fcb   = jax.random.normal(ks[5], (LAYERS, 1, F_DIM), jnp.float32) * 0.05
    downw = jax.random.normal(ks[6], (F_DIM, DOWN), jnp.float32) * 0.05
    downb = jax.random.normal(ks[7], (1, DOWN), jnp.float32) * 0.05
    # FC_out: (128 -> CLASSES); pad columns to CP=128 with zeros.
    outw = jnp.zeros((DOWN, CP), jnp.float32)
    outw = outw.at[:, :CLASSES].set(
        jax.random.normal(ks[8], (DOWN, CLASSES), jnp.float32) * 0.05)
    outb = jnp.zeros((1, CP), jnp.float32)
    outb = outb.at[:, :CLASSES].set(
        jax.random.normal(ks[9], (1, CLASSES), jnp.float32) * 0.05)

    # torch: cat((proteins, molecules), dim=1) then permute to (B, F, L);
    # in channels-last layout this is just a seq-dim concat.
    x = jnp.concatenate([proteins, molecules], axis=1)      # (B, L_SEQ, F_DIM)

    dti = lenet_forward(x, convw, convb, fcw, fcb, downw, downb, outw, outb)
    dti = jax.block_until_ready(dti)

    ref = lenet_reference(x, convw, convb, fcw, fcb, downw, downb, outw, outb)
    np.testing.assert_allclose(np.asarray(dti), np.asarray(ref),
                               rtol=2e-3, atol=2e-3)
    assert dti.shape == (B, CLASSES)
    print("KERNEL_OK")
</pallas_src>

<mosaic_0001>
module attributes {stable_mosaic.version = 11 : i64} {
  func.func @lenet_kernel(%arg0: i32, %arg1: memref<32x128xf32, #tpu.memory_space<vmem>>, %arg2: memref<1x7x128x128xbf16, #tpu.memory_space<vmem>>, %arg3: memref<1x1x128xf32, #tpu.memory_space<vmem>>, %arg4: memref<3x128x128xbf16, #tpu.memory_space<vmem>>, %arg5: memref<3x1x128xf32, #tpu.memory_space<vmem>>, %arg6: memref<128x128xf32, #tpu.memory_space<vmem>>, %arg7: memref<1x128xf32, #tpu.memory_space<vmem>>, %arg8: memref<8x128xf32, #tpu.memory_space<vmem>>, %arg9: memref<32x128xf32, #tpu.memory_space<vmem>>) attributes {dimension_semantics = [#tpu.dimension_semantics<arbitrary>], iteration_bounds = array<i64: 3>, scalar_prefetch = 0 : i64, scratch_operands = 1 : i64, tpu.core_type = #tpu.core_type<tc>, window_params = [{pipeline_mode = #tpu.pipeline_mode<synchronous>, transform_indices = @transform_0, window_bounds = array<i64: 32, 128>}, {transform_indices = @transform_1, window_bounds = array<i64: 1, 7, 128, 128>}, {transform_indices = @transform_2, window_bounds = array<i64: 1, 1, 128>}, {pipeline_mode = #tpu.pipeline_mode<synchronous>, transform_indices = @transform_3, window_bounds = array<i64: 3, 128, 128>}, {pipeline_mode = #tpu.pipeline_mode<synchronous>, transform_indices = @transform_4, window_bounds = array<i64: 3, 1, 128>}, {pipeline_mode = #tpu.pipeline_mode<synchronous>, transform_indices = @transform_5, window_bounds = array<i64: 128, 128>}, {pipeline_mode = #tpu.pipeline_mode<synchronous>, transform_indices = @transform_6, window_bounds = array<i64: 1, 128>}, {pipeline_mode = #tpu.pipeline_mode<synchronous>, transform_indices = @transform_7, window_bounds = array<i64: 8, 128>}]} {
    %c0_i32 = arith.constant 0 : i32
    %0 = arith.cmpi eq, %arg0, %c0_i32 : i32
    %1 = arith.extui %0 : i1 to i32
    %c0_i32_0 = arith.constant 0 : i32
    %2 = arith.cmpi ne, %1, %c0_i32_0 : i32
    scf.if %2 {
      %c0_71 = arith.constant 0 : index
      %c0_72 = arith.constant 0 : index
      %152 = vector.load %arg1[%c0_71, %c0_72] : memref<32x128xf32, #tpu.memory_space<vmem>>, vector<32x128xf32>
      %c0_73 = arith.constant 0 : index
      %c0_74 = arith.constant 0 : index
      %153 = vector.load %arg9[%c0_73, %c0_74] : memref<32x128xf32, #tpu.memory_space<vmem>>, vector<32x128xf32>
      tpu.vector_store %arg9[%c0_73, %c0_74], %152 {strides = array<i32>} : memref<32x128xf32, #tpu.memory_space<vmem>>, vector<32x128xf32>,
    } else {
    }
    %c0 = arith.constant 0 : index
    %c0_1 = arith.constant 0 : index
    %3 = vector.load %arg9[%c0, %c0_1] : memref<32x128xf32, #tpu.memory_space<vmem>>, vector<32x128xf32>
    %4 = arith.truncf %3 : vector<32x128xf32> to vector<32x128xbf16>
    %5 = tpu.iota {dimensions = array<i32: 0>} : vector<32x1xi32>
    %c16_i32 = arith.constant 16 : i32
    %c0_i32_2 = arith.constant 0 : i32
    %6 = arith.cmpi eq, %c16_i32, %c0_i32_2 : i32
    %c1_i32 = arith.constant 1 : i32
    %7 = arith.select %6, %c1_i32, %c16_i32 : i32
    %8 = vector.broadcast %7 : i32 to vector<32x1xi32>
    %9 = arith.remsi %5, %8 : vector<32x1xi32>
    %c0_i32_3 = arith.constant 0 : i32
    %10 = vector.broadcast %c0_i32_3 : i32 to vector<32x1xi32>
    %11 = arith.cmpi ne, %9, %10 : vector<32x1xi32>
    %c0_i32_4 = arith.constant 0 : i32
    %12 = vector.broadcast %c0_i32_4 : i32 to vector<32x1xi32>
    %13 = arith.cmpi slt, %9, %12 : vector<32x1xi32>
    %c0_i32_5 = arith.constant 0 : i32
    %14 = arith.cmpi slt, %7, %c0_i32_5 : i32
    %15 = vector.broadcast %14 : i1 to vector<32x1xi1>
    %16 = vector.broadcast %15 : vector<32x1xi1> to vector<32x1xi1>
    %17 = arith.xori %13, %16 : vector<32x1xi1>
    %18 = arith.andi %17, %11 : vector<32x1xi1>
    %19 = vector.broadcast %7 : i32 to vector<32x1xi32>
    %20 = arith.addi %9, %19 : vector<32x1xi32>
    %21 = arith.select %18, %20, %9 : vector<32x1xi1>, vector<32x1xi32>
    %cst = arith.constant 0.000000e+00 : f32
    %22 = vector.broadcast %cst : f32 to vector<32x128xf32>
    %c3_i32 = arith.constant 3 : i32
    %23 = tpu.dynamic_rotate %3 by %c3_i32 dim 0 : vector<32x128xf32>, i32 -> vector<32x128xf32>
    %c-3_i32 = arith.constant -3 : i32
    %24 = vector.broadcast %c-3_i32 : i32 to vector<32x1xi32>
    %25 = arith.addi %21, %24 : vector<32x1xi32>
    %c0_i32_6 = arith.constant 0 : i32
    %26 = vector.broadcast %c0_i32_6 : i32 to vector<32x1xi32>
    %27 = arith.cmpi sge, %25, %26 : vector<32x1xi32>
    %c-3_i32_7 = arith.constant -3 : i32
    %28 = vector.broadcast %c-3_i32_7 : i32 to vector<32x1xi32>
    %29 = arith.addi %21, %28 : vector<32x1xi32>
    %c16_i32_8 = arith.constant 16 : i32
    %30 = vector.broadcast %c16_i32_8 : i32 to vector<32x1xi32>
    %31 = arith.cmpi slt, %29, %30 : vector<32x1xi32>
    %32 = arith.andi %27, %31 : vector<32x1xi1>
    %cst_9 = arith.constant 0.000000e+00 : f32
    %33 = vector.shape_cast %32 : vector<32x1xi1> to vector<32x1xi1>
    %34 = vector.broadcast %33 : vector<32x1xi1> to vector<32x128xi1>
    %35 = vector.broadcast %cst_9 : f32 to vector<32x128xf32>
    %36 = arith.select %34, %23, %35 : vector<32x128xi1>, vector<32x128xf32>
    %37 = arith.truncf %36 : vector<32x128xf32> to vector<32x128xbf16>
    %c0_10 = arith.constant 0 : index
    %c0_11 = arith.constant 0 : index
    %c0_12 = arith.constant 0 : index
    %c0_13 = arith.constant 0 : index
    %38 = vector.load %arg2[%c0_10, %c0_11, %c0_12, %c0_13] : memref<1x7x128x128xbf16, #tpu.memory_space<vmem>>, vector<1x1x128x128xbf16>
    %39 = vector.shape_cast %38 : vector<1x1x128x128xbf16> to vector<128x128xbf16>
    %cst_14 = arith.constant dense<0.000000e+00> : vector<32x128xf32>
    %40 = tpu.matmul %37, %39, %cst_14 {dimension_numbers = #tpu.dot_dimension_numbers<[1], [0], [0], [1], [0, 0, 1, 1], [], []>} : vector<32x128xbf16>, vector<128x128xbf16>, vector<32x128xf32> -> vector<32x128xf32>
    %41 = arith.addf %22, %40 : vector<32x128xf32>
    %c2_i32 = arith.constant 2 : i32
    %42 = tpu.dynamic_rotate %3 by %c2_i32 dim 0 : vector<32x128xf32>, i32 -> vector<32x128xf32>
    %c-2_i32 = arith.constant -2 : i32
    %43 = vector.broadcast %c-2_i32 : i32 to vector<32x1xi32>
    %44 = arith.addi %21, %43 : vector<32x1xi32>
    %c0_i32_15 = arith.constant 0 : i32
    %45 = vector.broadcast %c0_i32_15 : i32 to vector<32x1xi32>
    %46 = arith.cmpi sge, %44, %45 : vector<32x1xi32>
    %c-2_i32_16 = arith.constant -2 : i32
    %47 = vector.broadcast %c-2_i32_16 : i32 to vector<32x1xi32>
    %48 = arith.addi %21, %47 : vector<32x1xi32>
    %c16_i32_17 = arith.constant 16 : i32
    %49 = vector.broadcast %c16_i32_17 : i32 to vector<32x1xi32>
    %50 = arith.cmpi slt, %48, %49 : vector<32x1xi32>
    %51 = arith.andi %46, %50 : vector<32x1xi1>
    %cst_18 = arith.constant 0.000000e+00 : f32
    %52 = vector.shape_cast %51 : vector<32x1xi1> to vector<32x1xi1>
    %53 = vector.broadcast %52 : vector<32x1xi1> to vector<32x128xi1>
    %54 = vector.broadcast %cst_18 : f32 to vector<32x128xf32>
    %55 = arith.select %53, %42, %54 : vector<32x128xi1>, vector<32x128xf32>
    %56 = arith.truncf %55 : vector<32x128xf32> to vector<32x128xbf16>
    %c0_19 = arith.constant 0 : index
    %c1 = arith.constant 1 : index
    %c0_20 = arith.constant 0 : index
    %c0_21 = arith.constant 0 : index
    %57 = vector.load %arg2[%c0_19, %c1, %c0_20, %c0_21] : memref<1x7x128x128xbf16, #tpu.memory_space<vmem>>, vector<1x1x128x128xbf16>
    %58 = vector.shape_cast %57 : vector<1x1x128x128xbf16> to vector<128x128xbf16>
    %cst_22 = arith.constant dense<0.000000e+00> : vector<32x128xf32>
    %59 = tpu.matmul %56, %58, %cst_22 {dimension_numbers = #tpu.dot_dimension_numbers<[1], [0], [0], [1], [0, 0, 1, 1], [], []>} : vector<32x128xbf16>, vector<128x128xbf16>, vector<32x128xf32> -> vector<32x128xf32>
    %60 = arith.addf %41, %59 : vector<32x128xf32>
    %c1_i32_23 = arith.constant 1 : i32
    %61 = tpu.dynamic_rotate %3 by %c1_i32_23 dim 0 : vector<32x128xf32>, i32 -> vector<32x128xf32>
    %c-1_i32 = arith.constant -1 : i32
    %62 = vector.broadcast %c-1_i32 : i32 to vector<32x1xi32>
    %63 = arith.addi %21, %62 : vector<32x1xi32>
    %c0_i32_24 = arith.constant 0 : i32
    %64 = vector.broadcast %c0_i32_24 : i32 to vector<32x1xi32>
    %65 = arith.cmpi sge, %63, %64 : vector<32x1xi32>
    %c-1_i32_25 = arith.constant -1 : i32
    %66 = vector.broadcast %c-1_i32_25 : i32 to vector<32x1xi32>
    %67 = arith.addi %21, %66 : vector<32x1xi32>
    %c16_i32_26 = arith.constant 16 : i32
    %68 = vector.broadcast %c16_i32_26 : i32 to vector<32x1xi32>
    %69 = arith.cmpi slt, %67, %68 : vector<32x1xi32>
    %70 = arith.andi %65, %69 : vector<32x1xi1>
    %cst_27 = arith.constant 0.000000e+00 : f32
    %71 = vector.shape_cast %70 : vector<32x1xi1> to vector<32x1xi1>
    %72 = vector.broadcast %71 : vector<32x1xi1> to vector<32x128xi1>
    %73 = vector.broadcast %cst_27 : f32 to vector<32x128xf32>
    %74 = arith.select %72, %61, %73 : vector<32x128xi1>, vector<32x128xf32>
    %75 = arith.truncf %74 : vector<32x128xf32> to vector<32x128xbf16>
    %c0_28 = arith.constant 0 : index
    %c2 = arith.constant 2 : index
    %c0_29 = arith.constant 0 : index
    %c0_30 = arith.constant 0 : index
    %76 = vector.load %arg2[%c0_28, %c2, %c0_29, %c0_30] : memref<1x7x128x128xbf16, #tpu.memory_space<vmem>>, vector<1x1x128x128xbf16>
    %77 = vector.shape_cast %76 : vector<1x1x128x128xbf16> to vector<128x128xbf16>
    %cst_31 = arith.constant dense<0.000000e+00> : vector<32x128xf32>
    %78 = tpu.matmul %75, %77, %cst_31 {dimension_numbers = #tpu.dot_dimension_numbers<[1], [0], [0], [1], [0, 0, 1, 1], [], []>} : vector<32x128xbf16>, vector<128x128xbf16>, vector<32x128xf32> -> vector<32x128xf32>
    %79 = arith.addf %60, %78 : vector<32x128xf32>
    %c0_32 = arith.constant 0 : index
    %c3 = arith.constant 3 : index
    %c0_33 = arith.constant 0 : index
    %c0_34 = arith.constant 0 : index
    %80 = vector.load %arg2[%c0_32, %c3, %c0_33, %c0_34] : memref<1x7x128x128xbf16, #tpu.memory_space<vmem>>, vector<1x1x128x128xbf16>
    %81 = vector.shape_cast %80 : vector<1x1x128x128xbf16> to vector<128x128xbf16>
    %cst_35 = arith.constant dense<0.000000e+00> : vector<32x128xf32>
    %82 = tpu.matmul %4, %81, %cst_35 {dimension_numbers = #tpu.dot_dimension_numbers<[1], [0], [0], [1], [0, 0, 1, 1], [], []>} : vector<32x128xbf16>, vector<128x128xbf16>, vector<32x128xf32> -> vector<32x128xf32>
    %83 = arith.addf %79, %82 : vector<32x128xf32>
    %c31_i32 = arith.constant 31 : i32
    %84 = tpu.dynamic_rotate %3 by %c31_i32 dim 0 : vector<32x128xf32>, i32 -> vector<32x128xf32>
    %c1_i32_36 = arith.constant 1 : i32
    %85 = vector.broadcast %c1_i32_36 : i32 to vector<32x1xi32>
    %86 = arith.addi %21, %85 : vector<32x1xi32>
    %c0_i32_37 = arith.constant 0 : i32
    %87 = vector.broadcast %c0_i32_37 : i32 to vector<32x1xi32>
    %88 = arith.cmpi sge, %86, %87 : vector<32x1xi32>
    %c1_i32_38 = arith.constant 1 : i32
    %89 = vector.broadcast %c1_i32_38 : i32 to vector<32x1xi32>
    %90 = arith.addi %21, %89 : vector<32x1xi32>
    %c16_i32_39 = arith.constant 16 : i32
    %91 = vector.broadcast %c16_i32_39 : i32 to vector<32x1xi32>
    %92 = arith.cmpi slt, %90, %91 : vector<32x1xi32>
    %93 = arith.andi %88, %92 : vector<32x1xi1>
    %cst_40 = arith.constant 0.000000e+00 : f32
    %94 = vector.shape_cast %93 : vector<32x1xi1> to vector<32x1xi1>
    %95 = vector.broadcast %94 : vector<32x1xi1> to vector<32x128xi1>
    %96 = vector.broadcast %cst_40 : f32 to vector<32x128xf32>
    %97 = arith.select %95, %84, %96 : vector<32x128xi1>, vector<32x128xf32>
    %98 = arith.truncf %97 : vector<32x128xf32> to vector<32x128xbf16>
    %c0_41 = arith.constant 0 : index
    %c4 = arith.constant 4 : index
    %c0_42 = arith.constant 0 : index
    %c0_43 = arith.constant 0 : index
    %99 = vector.load %arg2[%c0_41, %c4, %c0_42, %c0_43] : memref<1x7x128x128xbf16, #tpu.memory_space<vmem>>, vector<1x1x128x128xbf16>
    %100 = vector.shape_cast %99 : vector<1x1x128x128xbf16> to vector<128x128xbf16>
    %cst_44 = arith.constant dense<0.000000e+00> : vector<32x128xf32>
    %101 = tpu.matmul %98, %100, %cst_44 {dimension_numbers = #tpu.dot_dimension_numbers<[1], [0], [0], [1], [0, 0, 1, 1], [], []>} : vector<32x128xbf16>, vector<128x128xbf16>, vector<32x128xf32> -> vector<32x128xf32>
    %102 = arith.addf %83, %101 : vector<32x128xf32>
    %c30_i32 = arith.constant 30 : i32
    %103 = tpu.dynamic_rotate %3 by %c30_i32 dim 0 : vector<32x128xf32>, i32 -> vector<32x128xf32>
    %c2_i32_45 = arith.constant 2 : i32
    %104 = vector.broadcast %c2_i32_45 : i32 to vector<32x1xi32>
    %105 = arith.addi %21, %104 : vector<32x1xi32>
    %c0_i32_46 = arith.constant 0 : i32
    %106 = vector.broadcast %c0_i32_46 : i32 to vector<32x1xi32>
    %107 = arith.cmpi sge, %105, %106 : vector<32x1xi32>
    %c2_i32_47 = arith.constant 2 : i32
    %108 = vector.broadcast %c2_i32_47 : i32 to vector<32x1xi32>
    %109 = arith.addi %21, %108 : vector<32x1xi32>
    %c16_i32_48 = arith.constant 16 : i32
    %110 = vector.broadcast %c16_i32_48 : i32 to vector<32x1xi32>
    %111 = arith.cmpi slt, %109, %110 : vector<32x1xi32>
    %112 = arith.andi %107, %111 : vector<32x1xi1>
    %cst_49 = arith.constant 0.000000e+00 : f32
    %113 = vector.shape_cast %112 : vector<32x1xi1> to vector<32x1xi1>
    %114 = vector.broadcast %113 : vector<32x1xi1> to vector<32x128xi1>
    %115 = vector.broadcast %cst_49 : f32 to vector<32x128xf32>
    %116 = arith.select %114, %103, %115 : vector<32x128xi1>, vector<32x128xf32>
    %117 = arith.truncf %116 : vector<32x128xf32> to vector<32x128xbf16>
    %c0_50 = arith.constant 0 : index
    %c5 = arith.constant 5 : index
    %c0_51 = arith.constant 0 : index
    %c0_52 = arith.constant 0 : index
    %118 = vector.load %arg2[%c0_50, %c5, %c0_51, %c0_52] : memref<1x7x128x128xbf16, #tpu.memory_space<vmem>>, vector<1x1x128x128xbf16>
    %119 = vector.shape_cast %118 : vector<1x1x128x128xbf16> to vector<128x128xbf16>
    %cst_53 = arith.constant dense<0.000000e+00> : vector<32x128xf32>
    %120 = tpu.matmul %117, %119, %cst_53 {dimension_numbers = #tpu.dot_dimension_numbers<[1], [0], [0], [1], [0, 0, 1, 1], [], []>} : vector<32x128xbf16>, vector<128x128xbf16>, vector<32x128xf32> -> vector<32x128xf32>
    %121 = arith.addf %102, %120 : vector<32x128xf32>
    %c29_i32 = arith.constant 29 : i32
    %122 = tpu.dynamic_rotate %3 by %c29_i32 dim 0 : vector<32x128xf32>, i32 -> vector<32x128xf32>
    %c3_i32_54 = arith.constant 3 : i32
    %123 = vector.broadcast %c3_i32_54 : i32 to vector<32x1xi32>
    %124 = arith.addi %21, %123 : vector<32x1xi32>
    %c0_i32_55 = arith.constant 0 : i32
    %125 = vector.broadcast %c0_i32_55 : i32 to vector<32x1xi32>
    %126 = arith.cmpi sge, %124, %125 : vector<32x1xi32>
    %c3_i32_56 = arith.constant 3 : i32
    %127 = vector.broadcast %c3_i32_56 : i32 to vector<32x1xi32>
    %128 = arith.addi %21, %127 : vector<32x1xi32>
    %c16_i32_57 = arith.constant 16 : i32
    %129 = vector.broadcast %c16_i32_57 : i32 to vector<32x1xi32>
    %130 = arith.cmpi slt, %128, %129 : vector<32x1xi32>
    %131 = arith.andi %126, %130 : vector<32x1xi1>
    %cst_58 = arith.constant 0.000000e+00 : f32
    %132 = vector.shape_cast %131 : vector<32x1xi1> to vector<32x1xi1>
    %133 = vector.broadcast %132 : vector<32x1xi1> to vector<32x128xi1>
    %134 = vector.broadcast %cst_58 : f32 to vector<32x128xf32>
    %135 = arith.select %133, %122, %134 : vector<32x128xi1>, vector<32x128xf32>
    %136 = arith.truncf %135 : vector<32x128xf32> to vector<32x128xbf16>
    %c0_59 = arith.constant 0 : index
    %c6 = arith.constant 6 : index
    %c0_60 = arith.constant 0 : index
    %c0_61 = arith.constant 0 : index
    %137 = vector.load %arg2[%c0_59, %c6, %c0_60, %c0_61] : memref<1x7x128x128xbf16, #tpu.memory_space<vmem>>, vector<1x1x128x128xbf16>
    %138 = vector.shape_cast %137 : vector<1x1x128x128xbf16> to vector<128x128xbf16>
    %cst_62 = arith.constant dense<0.000000e+00> : vector<32x128xf32>
    %139 = tpu.matmul %136, %138, %cst_62 {dimension_numbers = #tpu.dot_dimension_numbers<[1], [0], [0], [1], [0, 0, 1, 1], [], []>} : vector<32x128xbf16>, vector<128x128xbf16>, vector<32x128xf32> -> vector<32x128xf32>
    %140 = arith.addf %121, %139 : vector<32x128xf32>
    %c0_63 = arith.constant 0 : index
    %c0_64 = arith.constant 0 : index
    %c0_65 = arith.constant 0 : index
    %141 = vector.load %arg3[%c0_63, %c0_64, %c0_65] : memref<1x1x128xf32, #tpu.memory_space<vmem>>, vector<1x1x128xf32>
    %142 = vector.shape_cast %141 : vector<1x1x128xf32> to vector<1x128xf32>
    %143 = vector.broadcast %142 : vector<1x128xf32> to vector<32x128xf32>
    %144 = arith.addf %140, %143 : vector<32x128xf32>
    %cst_66 = arith.constant 0.000000e+00 : f32
    %145 = vector.broadcast %cst_66 : f32 to vector<32x128xf32>
    %146 = arith.maximumf %144, %145 : vector<32x128xf32>
    %147 = arith.addf %146, %3 : vector<32x128xf32>
    %c0_67 = arith.constant 0 : index
    %c0_68 = arith.constant 0 : index
    %148 = vector.load %arg9[%c0_67, %c0_68] : memref<32x128xf32, #tpu.memory_space<vmem>>, vector<32x128xf32>
    tpu.vector_store %arg9[%c0_67, %c0_68], %147 {strides = array<i32>} : memref<32x128xf32, #tpu.memory_space<vmem>>, vector<32x128xf32>,
    %c2_i32_69 = arith.constant 2 : i32
    %149 = arith.cmpi eq, %arg0, %c2_i32_69 : i32
    %150 = arith.extui %149 : i1 to i32
    %c0_i32_70 = arith.constant 0 : i32
    %151 = arith.cmpi ne, %150, %c0_i32_70 : i32
    scf.if %151 {
      %152 = vector.extract_strided_slice %147 {offsets = [0, 0], sizes = [16, 128], strides = [1, 1]} : vector<32x128xf32> to vector<16x128xf32>
      %cst_71 = arith.constant dense<0.000000e+00> : vector<128xf32>
      %153 = vector.multi_reduction <add>, %152, %cst_71 [0] : vector<16x128xf32> to vector<128xf32>
      %154 = vector.shape_cast %153 : vector<128xf32> to vector<1x128xf32>
      %155 = vector.extract_strided_slice %147 {offsets = [16, 0], sizes = [16, 128], strides = [1, 1]} : vector<32x128xf32> to vector<16x128xf32>
      %cst_72 = arith.constant dense<0.000000e+00> : vector<128xf32>
      %156 = vector.multi_reduction <add>, %155, %cst_72 [0] : vector<16x128xf32> to vector<128xf32>
      %157 = vector.shape_cast %156 : vector<128xf32> to vector<1x128xf32>
      %cst_73 = arith.constant 0.000000e+00 : f32
      %158 = vector.broadcast %cst_73 : f32 to vector<6x128xf32>
      %159 = tpu.concatenate %154, %157, %158 in 0 : vector<1x128xf32>, vector<1x128xf32>, vector<6x128xf32> -> vector<8x128xf32>
      %cst_74 = arith.constant 6.250000e-02 : f32
      %160 = vector.broadcast %cst_74 : f32 to vector<8x128xf32>
      %161 = arith.mulf %159, %160 : vector<8x128xf32>
      %162 = arith.truncf %161 : vector<8x128xf32> to vector<8x128xbf16>
      %c0_75 = arith.constant 0 : index
      %c0_76 = arith.constant 0 : index
      %c0_77 = arith.constant 0 : index
      %163 = vector.load %arg4[%c0_75, %c0_76, %c0_77] : memref<3x128x128xbf16, #tpu.memory_space<vmem>>, vector<1x128x128xbf16>
      %164 = vector.shape_cast %163 : vector<1x128x128xbf16> to vector<128x128xbf16>
      %cst_78 = arith.constant dense<0.000000e+00> : vector<8x128xf32>
      %165 = tpu.matmul %162, %164, %cst_78 {dimension_numbers = #tpu.dot_dimension_numbers<[1], [0], [0], [1], [0, 0, 1, 1], [], []>} : vector<8x128xbf16>, vector<128x128xbf16>, vector<8x128xf32> -> vector<8x128xf32>
      %c0_79 = arith.constant 0 : index
      %c0_80 = arith.constant 0 : index
      %c0_81 = arith.constant 0 : index
      %166 = vector.load %arg5[%c0_79, %c0_80, %c0_81] : memref<3x1x128xf32, #tpu.memory_space<vmem>>, vector<1x1x128xf32>
      %167 = vector.shape_cast %166 : vector<1x1x128xf32> to vector<1x128xf32>
      %168 = vector.broadcast %167 : vector<1x128xf32> to vector<8x128xf32>
      %169 = arith.addf %165, %168 : vector<8x128xf32>
      %cst_82 = arith.constant 0.000000e+00 : f32
      %170 = vector.broadcast %cst_82 : f32 to vector<8x128xf32>
      %171 = arith.maximumf %169, %170 : vector<8x128xf32>
      %172 = arith.truncf %171 : vector<8x128xf32> to vector<8x128xbf16>
      %c1_83 = arith.constant 1 : index
      %c0_84 = arith.constant 0 : index
      %c0_85 = arith.constant 0 : index
      %173 = vector.load %arg4[%c1_83, %c0_84, %c0_85] : memref<3x128x128xbf16, #tpu.memory_space<vmem>>, vector<1x128x128xbf16>
      %174 = vector.shape_cast %173 : vector<1x128x128xbf16> to vector<128x128xbf16>
      %cst_86 = arith.constant dense<0.000000e+00> : vector<8x128xf32>
      %175 = tpu.matmul %172, %174, %cst_86 {dimension_numbers = #tpu.dot_dimension_numbers<[1], [0], [0], [1], [0, 0, 1, 1], [], []>} : vector<8x128xbf16>, vector<128x128xbf16>, vector<8x128xf32> -> vector<8x128xf32>
      %c1_87 = arith.constant 1 : index
      %c0_88 = arith.constant 0 : index
      %c0_89 = arith.constant 0 : index
      %176 = vector.load %arg5[%c1_87, %c0_88, %c0_89] : memref<3x1x128xf32, #tpu.memory_space<vmem>>, vector<1x1x128xf32>
      %177 = vector.shape_cast %176 : vector<1x1x128xf32> to vector<1x128xf32>
      %178 = vector.broadcast %177 : vector<1x128xf32> to vector<8x128xf32>
      %179 = arith.addf %175, %178 : vector<8x128xf32>
      %cst_90 = arith.constant 0.000000e+00 : f32
      %180 = vector.broadcast %cst_90 : f32 to vector<8x128xf32>
      %181 = arith.maximumf %179, %180 : vector<8x128xf32>
      %182 = arith.truncf %181 : vector<8x128xf32> to vector<8x128xbf16>
      %c2_91 = arith.constant 2 : index
      %c0_92 = arith.constant 0 : index
      %c0_93 = arith.constant 0 : index
      %183 = vector.load %arg4[%c2_91, %c0_92, %c0_93] : memref<3x128x128xbf16, #tpu.memory_space<vmem>>, vector<1x128x128xbf16>
      %184 = vector.shape_cast %183 : vector<1x128x128xbf16> to vector<128x128xbf16>
      %cst_94 = arith.constant dense<0.000000e+00> : vector<8x128xf32>
      %185 = tpu.matmul %182, %184, %cst_94 {dimension_numbers = #tpu.dot_dimension_numbers<[1], [0], [0], [1], [0, 0, 1, 1], [], []>} : vector<8x128xbf16>, vector<128x128xbf16>, vector<8x128xf32> -> vector<8x128xf32>
      %c2_95 = arith.constant 2 : index
      %c0_96 = arith.constant 0 : index
      %c0_97 = arith.constant 0 : index
      %186 = vector.load %arg5[%c2_95, %c0_96, %c0_97] : memref<3x1x128xf32, #tpu.memory_space<vmem>>, vector<1x1x128xf32>
      %187 = vector.shape_cast %186 : vector<1x1x128xf32> to vector<1x128xf32>
      %188 = vector.broadcast %187 : vector<1x128xf32> to vector<8x128xf32>
      %189 = arith.addf %185, %188 : vector<8x128xf32>
      %cst_98 = arith.constant 0.000000e+00 : f32
      %190 = vector.broadcast %cst_98 : f32 to vector<8x128xf32>
      %191 = arith.maximumf %189, %190 : vector<8x128xf32>
      %c0_99 = arith.constant 0 : index
      %c0_100 = arith.constant 0 : index
      %192 = vector.load %arg6[%c0_99, %c0_100] : memref<128x128xf32, #tpu.memory_space<vmem>>, vector<128x128xf32>
      %cst_101 = arith.constant dense<0.000000e+00> : vector<8x128xf32>
      %193 = tpu.matmul %191, %192, %cst_101 {dimension_numbers = #tpu.dot_dimension_numbers<[1], [0], [0], [1], [0, 0, 1, 1], [], []>} : vector<8x128xf32>, vector<128x128xf32>, vector<8x128xf32> -> vector<8x128xf32>
      %c0_102 = arith.constant 0 : index
      %c0_103 = arith.constant 0 : index
      %194 = vector.load %arg7[%c0_102, %c0_103] : memref<1x128xf32, #tpu.memory_space<vmem>>, vector<1x128xf32>
      %195 = vector.broadcast %194 : vector<1x128xf32> to vector<8x128xf32>
      %196 = arith.addf %193, %195 : vector<8x128xf32>
      %c0_104 = arith.constant 0 : index
      %c0_105 = arith.constant 0 : index
      %197 = vector.load %arg8[%c0_104, %c0_105] : memref<8x128xf32, #tpu.memory_space<vmem>>, vector<8x128xf32>
      tpu.vector_store %arg8[%c0_104, %c0_105], %196 {strides = array<i32>} : memref<8x128xf32, #tpu.memory_space<vmem>>, vector<8x128xf32>,
    } else {
    }
    return
  }
  func.func @transform_0(%arg0: i32) -> (i32, i32) {
    %c0_i32 = arith.constant 0 : i32
    %c0_i32_0 = arith.constant 0 : i32
    %c0_i32_1 = arith.constant 0 : i32
    return %c0_i32, %c0_i32_0 : i32, i32
  }
  func.func @transform_1(%arg0: i32) -> (i32, i32, i32, i32) {
    %c0_i32 = arith.constant 0 : i32
    %c0_i32_0 = arith.constant 0 : i32
    %c0_i32_1 = arith.constant 0 : i32
    %c0_i32_2 = arith.constant 0 : i32
    return %arg0, %c0_i32, %c0_i32_0, %c0_i32_1 : i32, i32, i32, i32
  }
  func.func @transform_2(%arg0: i32) -> (i32, i32, i32) {
    %c0_i32 = arith.constant 0 : i32
    %c0_i32_0 = arith.constant 0 : i32
    %c0_i32_1 = arith.constant 0 : i32
    return %arg0, %c0_i32, %c0_i32_0 : i32, i32, i32
  }
  func.func @transform_3(%arg0: i32) -> (i32, i32, i32) {
    %c0_i32 = arith.constant 0 : i32
    %c0_i32_0 = arith.constant 0 : i32
    %c0_i32_1 = arith.constant 0 : i32
    %c0_i32_2 = arith.constant 0 : i32
    return %c0_i32, %c0_i32_0, %c0_i32_1 : i32, i32, i32
  }
  func.func @transform_4(%arg0: i32) -> (i32, i32, i32) {
    %c0_i32 = arith.constant 0 : i32
    %c0_i32_0 = arith.constant 0 : i32
    %c0_i32_1 = arith.constant 0 : i32
    %c0_i32_2 = arith.constant 0 : i32
    return %c0_i32, %c0_i32_0, %c0_i32_1 : i32, i32, i32
  }
  func.func @transform_5(%arg0: i32) -> (i32, i32) {
    %c0_i32 = arith.constant 0 : i32
    %c0_i32_0 = arith.constant 0 : i32
    %c0_i32_1 = arith.constant 0 : i32
    return %c0_i32, %c0_i32_0 : i32, i32
  }
  func.func @transform_6(%arg0: i32) -> (i32, i32) {
    %c0_i32 = arith.constant 0 : i32
    %c0_i32_0 = arith.constant 0 : i32
    %c0_i32_1 = arith.constant 0 : i32
    return %c0_i32, %c0_i32_0 : i32, i32
  }
  func.func @transform_7(%arg0: i32) -> (i32, i32) {
    %c0_i32 = arith.constant 0 : i32
    %c0_i32_0 = arith.constant 0 : i32
    %c0_i32_1 = arith.constant 0 : i32
    return %c0_i32, %c0_i32_0 : i32, i32
  }
}

</mosaic_0001>

<bundles_post_ra>
// kernel: tpu_custom_call.1
= control target key start
LH: loop header
LB: loop body
LE: loop exit
PB: predicated region body
PF: predicated region fallthrough
CT: control target
= control target key end

     0   :  { %s3616_s0 = inlined_call_operand.hbm [shape: f32[32,128], index: 0, kind: input, shape index: {}]   ;;  %s3617_s1 = inlined_call_operand.hbm [shape: bf16[3,7,128,128], index: 1, kind: input, shape index: {}]   ;;  %s3618_s2 = inlined_call_operand.vmem [shape: f32[3,1,128], index: 2, kind: input, shape index: {}]   ;;  %s3619_s3 = inlined_call_operand.hbm [shape: bf16[3,128,128], index: 3, kind: input, shape index: {}]   ;;  %s3620_s4 = inlined_call_operand.vmem [shape: f32[3,1,128], index: 4, kind: input, shape index: {}]   ;;  %s3621_s5 = inlined_call_operand.hbm [shape: f32[128,128], index: 5, kind: input, shape index: {}]   ;;  %s3622_s6 = inlined_call_operand.vmem [shape: f32[1,128], index: 6, kind: input, shape index: {}]   ;;  %s3623_s7 = inlined_call_operand.hbm [shape: f32[8,128], index: 7, kind: output, shape index: {}]  }
   0x1   :  { %3633 = sst [smem:[#allocation19_spill]] %s3619_s3 }
   0x2   :  { %3634 = sst [smem:[#allocation20_spill]] %s3623_s7 }
   0x3   :  { %12 = vsyncpa [#allocation4], 0 }
   0x4   :  { %13 = vsyncpa [#allocation7], 0 }
   0x5   :  { %15 = vsyncpa [#allocation7 + $0x1], 0 }
   0x6   :  { %16 = vsyncpa [#allocation10], 0 }
   0x7   :  { %17 = vsyncpa [#allocation5], 0  ;;  %s3092_s24 = smov 0   ;;  %s3094_s25 = smov 0  }
   0x8   :  { %s3096_s26 = smov 0   ;;  %s3098_s27 = smov 0  }
   0x9 LB: > { %s3111_s28 = sadd.s32 4294967295, %s3037_s27   ;;  %s3114_s29 = sadd.s32 1, %s3037_s27   ;;  %s3037_s27 = sphi %s3098_s27, %s3661_s27   ;;  %s3033_s26 = sphi %s3096_s26, %s3665_s26   ;;  %s3029_s25 = sphi %s3094_s25, %s3664_s25   ;;  %s3025_s24 = sphi %s3092_s24, %s3663_s24  }
   0xa   : > { %3635 = sst [smem:[#allocation17_spill]] %s3114_s29  ;;  %s48_s30 = ssub.s32 %s3037_s27, %s3114_s29 }
   0xb   : > { %s51_s8 = sadd.s32 1, %s3033_s26  ;;  %p49_p0 = scmp.eq.s32.totalorder %s48_s30, 0 }
   0xc   : > { %p58_p1 = scmp.ne.s32.totalorder %s3033_s26, %s3029_s25  ;;  %p59_p2 = scmp.eq.s32.totalorder %s3037_s27, 0 }
   0xd   : > { %p64_p3 = scmp.ne.s32.totalorder %s3029_s25, %s3025_s24  ;;  %p3624_p5 = scmp.eq.s32.totalorder %s3111_s28, 0 }
   0xe   : > { %s3124_s9 = scalar_select %p49_p0, %s3033_s26, %s51_s8  }
   0xf   : > { %p3126_p4 = por %p59_p2, %p58_p1  ;;  %p2047_p6 = scmp.ge.s32.totalorder %s3037_s27, 1 }
  0x10   : > { %3636 = sst [smem:[#allocation18_spill]] %s3124_s9  ;;  %p206_p7 = scmp.lt.s32.totalorder %s3037_s27, 4 }
  0x11   : > { %p3135_p8 = por %p3624_p5, %p64_p3  ;;  %s3039_s13 = smov [#allocation8]  }
  0x12   : > { %p3140_p10 = pnand %p2047_p6, %p206_p7  ;;  %s231_s14 = sshll.u32 %s3039_s13, 4  ;;  %s232_s14 = int_to_ptr.vmem [resolvable:$true] %s231_s14 }
  0x13   : > { %s3638_s11 = scalar_select %p3135_p8, 1, 0 }
  0x14   : > { %s3639_s12 = scalar_select %p3140_p10, 1, 0 }
  0x15   : > { %p2700_p11 = pneg %p3140_p10  ;;  %p2717_p13 = scmp.lt.s32.totalorder %s3037_s27, 3 }
  0x16   : > { %s3642_s3 = sld [smem:[#allocation19_spill]] }
  0x17   : > { %p3148_p12 = pnand %p2700_p11, %p3624_p5  ;;  %p3155_p0 = pnand %p2717_p13, %p3126_p4 }
  0x19   : > { %s3641_s16 = scalar_select %p3155_p0, 1, 0 }
  0x1a   : > { %p3167_p2 = pneg %p3148_p12 }
  0x1c   : > { %s2847_s19 = scalar_lea.hbm %s3642_s3, 3072 }
  0x1d   : > { %p2848_p1 = scmp.ne.s32.totalorder %s3642_s3, %s2847_s19  ;;  %p2854_p6 = scmp.lt.u32.totalorder %s2847_s19, %s3642_s3 }
  0x1f   : > { %p2850_p3 = pnand %p3167_p2, %p2848_p1 }
  0x21   : > { %p2851_p4 = pneg %p2850_p3 }
  0x23   : > { %p2856_p7 = pnand %p2854_p6, %p2851_p4 }
  0x25   : > { %2859 = shalt.err (!%p2856_p7)
}
  0x26   : > { %s2860_s30 = scalar_lea.vmem %s232_s14, 3072  ;;  %p2868_p5 = scmp.lt.s32.totalorder %s232_s14, %s232_s14 }
  0x27   : > { %p2861_p11 = scmp.ne.s32.totalorder %s232_s14, %s2860_s30  ;;  %p2869_p8 = scmp.lt.s32.totalorder %s2860_s30, %s2860_s30 }
  0x29   : > { %p2863_p13 = pnand %p2861_p11, %p3167_p2  ;;  %p2870_p10 = por %p2869_p8, %p2868_p5 }
  0x2b   : > { %p2864_p9 = pneg %p2863_p13 }
  0x2d   : > { %p2871_p0 = pnand %p2870_p10, %p2864_p9 }
  0x2f   : > { %2874 = shalt.err (!%p2871_p0)
}
  0x30   : > { %s3630_s8 = smov 64   ;;  %s3631_s10 = smov 4  }
  0x31   : > { %2706 = dma.hbm_to_vmem [thread:$0]  (!%p3148_p12), %s3642_s3, 3072, %s232_s14, [#allocation7], %s3630_s8, %s3630_s8, %s3631_s10  }
  0x32   : > { %s3042_s18 = smov [#allocation3]   ;;  %s2875_s23 = scalar_lea.hbm %s3616_s0, 512 }
  0x33   : > { %s218_s19 = sshll.u32 %s3042_s18, 4  ;;  %p2876_p5 = scmp.ne.s32.totalorder %s3616_s0, %s2875_s23  ;;  %s219_s19 = int_to_ptr.vmem [resolvable:$true] %s218_s19 }
  0x34   : > { %p2882_p10 = scmp.lt.u32.totalorder %s2875_s23, %s3616_s0 }
  0x35   : > { %p2878_p8 = pnand %p2876_p5, %p3167_p2 }
  0x37   : > { %p2879_p9 = pneg %p2878_p8 }
  0x39   : > { %p2884_p0 = pnand %p2882_p10, %p2879_p9 }
  0x3b   : > { %2887 = shalt.err (!%p2884_p0)
}
  0x3c   : > { %s2888_s14 = scalar_lea.vmem %s219_s19, 512  ;;  %p2896_p6 = scmp.lt.s32.totalorder %s219_s19, %s219_s19 }
  0x3d   : > { %p2889_p1 = scmp.ne.s32.totalorder %s219_s19, %s2888_s14  ;;  %p2897_p7 = scmp.lt.s32.totalorder %s2888_s14, %s2888_s14 }
  0x3f   : > { %p2891_p3 = pnand %p2889_p1, %p3167_p2  ;;  %p2898_p11 = por %p2897_p7, %p2896_p6 }
  0x41   : > { %p2892_p4 = pneg %p2891_p3 }
  0x43   : > { %p2899_p13 = pnand %p2898_p11, %p2892_p4 }
  0x45   : > { %2902 = shalt.err (!%p2899_p13)
}
  0x46   : > { %s3043_s13 = smov 128   ;;  %s3044_s29 = smov 8  }
  0x47   : > { %2703 = dma.hbm_to_vmem [thread:$0]  (!%p3148_p12), %s3616_s0, 512, %s219_s19, [#allocation4], %s3043_s13, %s3043_s13, %s3044_s29  }
  0x48   : > { %s3045_s18 = smov [#allocation9]   ;;  %s264_s21 = sand.u32 1, %s3037_s27  }
  0x49   : > { %s247_s20 = sshll.u32 %s3045_s18, 4  ;;  %s266_s23 = sand.u32 1, %s3033_s26   ;;  %s248_s20 = int_to_ptr.vmem [resolvable:$true] %s247_s20 }
  0x4a   : > { %s2903_s14 = scalar_lea.hbm %s3621_s5, 2048 }
  0x4b   : > { %p2904_p5 = scmp.ne.s32.totalorder %s3621_s5, %s2903_s14  ;;  %p2910_p10 = scmp.lt.u32.totalorder %s2903_s14, %s3621_s5 }
  0x4d   : > { %p2906_p8 = pnand %p2904_p5, %p3167_p2 }
  0x4f   : > { %p2907_p9 = pneg %p2906_p8 }
  0x51   : > { %p2912_p0 = pnand %p2910_p10, %p2907_p9 }
  0x53   : > { %2915 = shalt.err (!%p2912_p0)
}
  0x54   : > { %s2916_s19 = scalar_lea.vmem %s248_s20, 2048  ;;  %p2924_p6 = scmp.lt.s32.totalorder %s248_s20, %s248_s20 }
  0x55   : > { %p2917_p1 = scmp.ne.s32.totalorder %s248_s20, %s2916_s19  ;;  %p2925_p7 = scmp.lt.s32.totalorder %s2916_s19, %s2916_s19 }
  0x57   : > { %p2919_p3 = pnand %p2917_p1, %p3167_p2  ;;  %p2926_p11 = por %p2925_p7, %p2924_p6 }
  0x59   : > { %p2920_p4 = pneg %p2919_p3 }
  0x5b   : > { %p2927_p13 = pnand %p2926_p11, %p2920_p4 }
  0x5d   : > { %2930 = shalt.err (!%p2927_p13)
}
  0x5e   : > { %2709 = dma.hbm_to_vmem [thread:$0]  (!%p3148_p12), %s3621_s5, 2048, %s248_s20, [#allocation10], %s3043_s13, %s3043_s13, %s3044_s29  }
  0x5f   : > { %s2679_s3 = smul.u32 448, %s266_s23  ;;  %s3232_s24 = scalar_lea.sflag [#allocation7], %s264_s21 }
  0x60   : > { %s2680_s7 = smul.u32 7168, %s3037_s27  ;;  %p3644_p12 = scmp.ne.s32.totalorder %s3641_s16, 0 }
  0x61   : > { %s268_s18 = scalar_lea.vmem [#allocation6], %s2679_s3  ;;  %s2936_s29 = scalar_lea.hbm %s3617_s1, 21504 }
  0x62   : > { %s3228_s17 = scalar_lea.hbm %s3617_s1, %s2680_s7  ;;  %s275_s15 = sshll.u32 %s268_s18, 4  ;;  %s3230_s15 = int_to_ptr.vmem [resolvable:$true] %s275_s15 }
  0x63   : > { %s2931_s30 = scalar_lea.hbm %s3228_s17, 7168  ;;  %p2933_p5 = pneg %p3644_p12 }
  0x64   : > { %p2932_p2 = scmp.ne.s32.totalorder %s3228_s17, %s2931_s30  ;;  %p2937_p10 = scmp.lt.u32.totalorder %s3228_s17, %s3617_s1 }
  0x65   : > { %p2938_p0 = scmp.lt.u32.totalorder %s2936_s29, %s2931_s30  ;;  %p2940_p3 = scmp.lt.u32.totalorder %s2931_s30, %s3228_s17 }
  0x66   : > { %p2934_p8 = pnand %p2933_p5, %p2932_p2 }
  0x67   : > { %p2939_p1 = por %p2938_p0, %p2937_p10 }
  0x68   : > { %p2935_p9 = pneg %p2934_p8 }
  0x69   : > { %p2941_p4 = por %p2940_p3, %p2939_p1 }
  0x6b   : > { %p2942_p6 = pnand %p2941_p4, %p2935_p9 }
  0x6d   : > { %2945 = shalt.err (!%p2942_p6)
}
  0x6e   : > { %s2946_s21 = scalar_lea.vmem %s3230_s15, 7168  ;;  %s3046_s14 = smov [#allocation6]  }
  0x6f   : > { %p2947_p7 = scmp.ne.s32.totalorder %s3230_s15, %s2946_s21  ;;  %s2951_s19 = sshll.u32 %s3046_s14, 4  ;;  %s2952_s19 = int_to_ptr.vmem [resolvable:$false] %s2951_s19 }
  0x70   : > { %s2953_s8 = scalar_lea.vmem %s2952_s19, 14336  ;;  %p2954_p2 = scmp.lt.s32.totalorder %s3230_s15, %s2952_s19 }
  0x71   : > { %p2949_p11 = pnand %p2947_p7, %p2933_p5  ;;  %p2955_p8 = scmp.lt.s32.totalorder %s2953_s8, %s2946_s21 }
  0x73   : > { %p2950_p13 = pneg %p2949_p11  ;;  %p2956_p10 = por %p2955_p8, %p2954_p2 }
  0x75   : > { %p2957_p0 = pnand %p2956_p10, %p2950_p13 }
  0x77   : > { %2960 = shalt.err (!%p2957_p0)
}
  0x78   : > { %s3645_s10 = smov 4   ;;  %s3646_s3 = smov 64  }
  0x79   : > { %2713 = dma.hbm_to_vmem [thread:$0]  (!%p3644_p12), %s3228_s17, 7168, %s3230_s15, %s3232_s24, %s3646_s3, %s3646_s3, %s3645_s10  }
  0x7a   : > { %p3647_p5 = scmp.ne.s32.totalorder %s3639_s12, 0 }
  0x7b   : > { %p3648_p9 = scmp.eq.s32.totalorder (!%p3647_p5), %s3111_s28, 0 }
  0x7c   : > { %293 = sbr.rel (%p3647_p5) target bundleno = 1428 (0x594), region = 48 }
  0x83   : > { %3004 = dma.done.wait (%p3648_p9), [#allocation4], 512   ;;  %p3649_p1 = pmov %p3648_p9 }
  0x84   : > { %s299_s16 = sand.u32 1, %s3111_s28   ;;  %s301_s7 = sand.u32 1, %s3029_s25  }
  0x85   : > { %3006 = vsyncadd (%p3649_p1), [#allocation4], 4294966784  ;;  %s2681_s9 = smul.u32 448, %s301_s7  ;;  %s300_s22 = scalar_lea.sflag [#allocation7], %s299_s16 }
  0x86   : > { %p3650_p3 = scmp.ne.s32.totalorder %s3638_s11, 0 }
  0x87   : > { %s3271_s18 = scalar_lea.vmem [#allocation6], %s2681_s9 }
  0x88   : > { %3008 = dma.done.wait (%p3650_p3), %s300_s22, 7168  }
  0x89   : > { %3010 = vsyncadd (%p3650_p3), %s300_s22, 4294960128  ;;  %p3651_p12 = pmov %p3649_p1 }
  0x8a   : > { %p3652_p4 = pmov %p3649_p1 }
  0x8b   : > { %3012 = dma.done.wait (%p3651_p12), [#allocation7], 3072  }
  0x8c   : > { %3014 = vsyncadd (%p3652_p4), [#allocation7], 4294964224  ;;  %p3653_p6 = pmov %p3649_p1 }
  0x8d   : > { %p3654_p7 = pmov %p3649_p1 }
  0x8e   : > { %3016 = dma.done.wait (%p3653_p6), [#allocation10], 2048  }
  0x8f   : > { %3018 = vsyncadd (%p3654_p7), [#allocation10], 4294965248  ;;  %p340_p11 = scmp.lt.s32.totalorder %s3111_s28, 2  ;;  %p3655_p13 = scmp.ne.s32.totalorder %s3111_s28, 0 }
  0x90   : > { %v348_v0 = vld [vmem:[#allocation3] sm:$0xff] (!%p3655_p13)  ;;  %v349_v1 = vld [vmem:[#allocation3 + $0x8] sm:$0xff] (!%p3655_p13)  ;;  %v350_v2 = vld [vmem:[#allocation3 + $0x10] sm:$0xff] (!%p3655_p13) }
  0x91   : > { %s3287_s12 = scalar_select %p340_p11, %s3111_s28, 2 }
  0x92   : > { %347 = sbr.rel (%p3655_p13) target bundleno = 153 (0x99), region = 68  ;;  %352 = vst [vmem:[#allocation2] sm:$0xff] (!%p3655_p13), %v348_v0  ;;  %353 = vst [vmem:[#allocation2 + $0x8] sm:$0xff] (!%p3655_p13), %v349_v1  ;;  %v351_v3 = vld [vmem:[#allocation3 + $0x18] sm:$0xff] (!%p3655_p13) }
  0x93   : > { %s342_s15 = scalar_lea.vmem %s3618_s2, %s3287_s12  ;;  %354 = vst [vmem:[#allocation2 + $0x10] sm:$0xff] (!%p3655_p13), %v350_v2  ;;  %355 = vst [vmem:[#allocation2 + $0x18] sm:$0xff] (!%p3655_p13), %v351_v3 }
  0x99 PF: > { %v2767_v4 = vld [vmem:[%s3271_s18 + $0x40] sm:$0xff]   ;;  %v362_v5 = vlaneseq  ;;  %v2769_v7 = vld [vmem:[%s3271_s18 + $0x48] sm:$0xff]   ;;  %v2771_v10 = vld [vmem:[%s3271_s18 + $0x50] sm:$0xff]   ;;  %vm3047_vm2 = vmmov 1   ;;  %p2247_p2 = scmp.ne.s32.totalorder %s3111_s28, 2 }
  0x9a   : > { %v2768_v6 = vld [vmem:[%s3271_s18 + $0xc0] sm:$0xff]   ;;  %2396 = vmatprep.subr.bf16.mxu1 %v2767_v4  ;;  %v2770_v8 = vld [vmem:[%s3271_s18 + $0xc8] sm:$0xff]   ;;  %v2772_v11 = vld [vmem:[%s3271_s18 + $0xd0] sm:$0xff]  }
  0x9b   : > { %2456 = vmatprep.subr.bf16.mxu0 %v2768_v6  ;;  %2397 = vmatpush3.bf16.msra.mxu1 %v2767_v4  ;;  %v3299_v9 = vshrl.u32 %v362_v5, 7  ;;  %v2773_v13 = vld [vmem:[%s3271_s18 + $0x58] sm:$0xff]   ;;  %v2775_v17 = vld [vmem:[%s3271_s18 + $0x60] sm:$0xff]   ;;  %v2777_v20 = vld [vmem:[%s3271_s18 + $0x68] sm:$0xff]  }
  0x9c   : > { %2457 = vmatpush3.bf16.msra.mxu0 %v2768_v6  ;;  %2398 = vmatprep.subr.bf16.mxu1 %v2769_v7  ;;  %v2774_v15 = vld [vmem:[%s3271_s18 + $0xd8] sm:$0xff]   ;;  %v2776_v19 = vld [vmem:[%s3271_s18 + $0xe0] sm:$0xff]   ;;  %v3317_v22 = vld [vmem:[#allocation2 + $0x8] sm:$0xff] }
  0x9d   : > { %2458 = vmatprep.subr.bf16.mxu0 %v2770_v8  ;;  %v3304_v12 = vand.u32 15, %v3299_v9  ;;  %v365_v14 = vadd.s32 16, %v3299_v9  ;;  %v3315_v21 = vld [vmem:[#allocation2] sm:$0xff]  ;;  %v3319_v23 = vld [vmem:[#allocation2 + $0x18] sm:$0xff]  ;;  %vm474_vm0 = vcmp.lt.s32.totalorder %v3299_v9, 2  ;;  %v2778_v25 = vld [vmem:[%s3271_s18 + $0xe8] sm:$0xff]  }
  0x9e   : > { %v470_v26 = vrot.slane %v3315_v21, 6  ;;  %v471_v27 = vrot.slane %v3317_v22, 6  ;;  %v473_v28 = vrot.slane %v3319_v23, 6  ;;  %v360_v29 = vpack.c.bf16 %v3317_v22, %v3315_v21  ;;  %v2779_v30 = vld [vmem:[%s3271_s18 + $0x70] sm:$0xff]   ;;  %v2781_v38 = vld [vmem:[%s3271_s18 + $0x78] sm:$0xff]   ;;  %v2783_v50 = vld [vmem:[%s3271_s18] sm:$0xff]  }
  0x9f   : > { %2399 = vmatpush3.bf16.msra.mxu1 %v2769_v7  ;;  %v479_v16 = vadd.s32 4294967294, %v3304_v12  ;;  %v3311_v18 = vand.u32 15, %v365_v14  ;;  %vm419_vm4 = vcmp.lt.s32.totalorder %v3299_v9, 3  ;;  %v3336_v34 = vld [vmem:[#allocation2 + $0x10] sm:$0xff]  ;;  %v364_v35 = vadd.s32 8, %v3299_v9  ;;  %v2782_v39 = vld [vmem:[%s3271_s18 + $0xf8] sm:$0xff]  }
  0xa0   : > { %2459 = vmatpush3.bf16.msra.mxu0 %v2770_v8  ;;  %2400 = vmatprep.subr.bf16.mxu1 %v2771_v10  ;;  %v477_v31 = vsel %vm474_vm0, %v470_v26, %v471_v27  ;;  %v478_v32 = vsel %vm474_vm0, %v473_v28, %v470_v26  ;;  %v2780_v36 = vld [vmem:[%s3271_s18 + $0xf0] sm:$0xff]   ;;  %v424_v37 = vadd.s32 4294967293, %v3304_v12  ;;  %v472_v40 = vrot.slane %v3336_v34, 6  ;;  %v2784_v52 = vld [vmem:[%s3271_s18 + $0x100] sm:$0xff]   ;;  %v2785_v59 = vld [vmem:[%s3271_s18 + $0x8] sm:$0xff]  }
  0xa1   : > { %2460 = vmatprep.subr.bf16.mxu0 %v2772_v11  ;;  %vm483_vm1 = vcmp.ge.s32.totalorder %v479_v16, 0  ;;  %v481_v24 = vadd.s32 4294967294, %v3311_v18  ;;  %2472 = vmatprep.mubr.bf16.mxu0 %v360_v29  ;;  %v2083_v33 = vpack.c.bf16 %v477_v31, %v478_v32  ;;  %v3344_v41 = vand.u32 15, %v364_v35  ;;  %v2786_v60 = vld [vmem:[%s3271_s18 + $0x108] sm:$0xff]   ;;  %v2787_v63 = vld [vmem:[%s3271_s18 + $0x10] sm:$0xff]   ;;  %v2789_v1 = vld [vmem:[%s3271_s18 + $0x18] sm:$0xff]  }
  0xa2   : > { %vm2082_vm3 = vmpackc.low %vm3047_vm2, %vm483_vm1  ;;  %vm999_vm6 = vcmp.lt.s32.totalorder %v3299_v9, 7  ;;  %v415_v42 = vrot.slane %v3315_v21, 5  ;;  %v416_v43 = vrot.slane %v3317_v22, 5  ;;  %v418_v44 = vrot.slane %v3319_v23, 5  ;;  %v2788_v0 = vld [vmem:[%s3271_s18 + $0x110] sm:$0xff]   ;;  %v2790_v2 = vld [vmem:[%s3271_s18 + $0x118] sm:$0xff]  }
  0xa3   : > { %2401 = vmatpush3.bf16.msra.mxu1 %v2771_v10  ;;  %2412 = vmatprep.mubr.msk.bf16.mxu1 %vm2082_vm3, %v2083_v33  ;;  %vm485_vm5 = vcmp.ge.s32.totalorder %v481_v24, 0  ;;  %v995_v45 = vrot.slane %v3315_v21, 1  ;;  %v475_v46 = vsel %vm474_vm0, %v472_v40, %v473_v28  ;;  %v476_v47 = vsel %vm474_vm0, %v471_v27, %v472_v40  ;;  %v2791_v3 = vld [vmem:[%s3271_s18 + $0x20] sm:$0xff]   ;;  %v2793_v7 = vld [vmem:[%s3271_s18 + $0x28] sm:$0xff]   ;;  %v2796_v16 = vld [vmem:[%s3271_s18 + $0x130] sm:$0xff]  }
  0xa4   : > { %2461 = vmatpush3.bf16.msra.mxu0 %v2772_v11  ;;  %2402 = vmatprep.subr.bf16.mxu1 %v2773_v13  ;;  %v996_v48 = vrot.slane %v3317_v22, 1  ;;  %v997_v49 = vrot.slane %v3336_v34, 1  ;;  %v1005_v51 = vadd.s32 1, %v3344_v41  ;;  %v2086_v53 = vpack.c.bf16 %v475_v46, %v476_v47  ;;  %vm2085_vm7 = vmpackc.low %vm3047_vm2, %vm485_vm5  ;;  %v2792_v4 = vld [vmem:[%s3271_s18 + $0x120] sm:$0xff]   ;;  %v2794_v10 = vld [vmem:[%s3271_s18 + $0x128] sm:$0xff]  }
  0xa5   : > { %2462 = vmatprep.subr.bf16.mxu0 %v2774_v15  ;;  %v422_v54 = vsel %vm419_vm4, %v415_v42, %v416_v43  ;;  %v423_v55 = vsel %vm419_vm4, %v418_v44, %v415_v42  ;;  %v361_v56 = vpack.c.bf16 %v3319_v23, %v3336_v34  ;;  %vm428_vm8 = vcmp.ge.s32.totalorder %v424_v37, 0  ;;  %v2798_v24 = vld [vmem:[%s3271_s18 + $0x138] sm:$0xff]   ;;  %v2801_v47 = vld [vmem:[%s3271_s18 + $0x88] sm:$0xff]  }
  0xa6   : > { %v1001_v57 = vsel %vm999_vm6, %v996_v48, %v997_v49  ;;  %v1002_v58 = vsel %vm999_vm6, %v995_v45, %v996_v48  ;;  %vm1013_vm9 = vcmp.lt.s32.totalorder %v1005_v51, 16  ;;  %v2097_v61 = vpack.c.bf16 %v422_v54, %v423_v55  ;;  %vm2096_vm10 = vmpackc.low %vm3047_vm2, %vm428_vm8  ;;  %v2802_v48 = vld [vmem:[%s3271_s18 + $0x148] sm:$0xff]   ;;  %v2803_v51 = vld [vmem:[%s3271_s18 + $0x90] sm:$0xff]  }
  0xa7   : > { %2403 = vmatpush3.bf16.msra.mxu1 %v2773_v13  ;;  %v2181_v62 = vpack.c.bf16 %v1001_v57, %v1002_v58  ;;  %vm2180_vm11 = vmpackc.low %vm1013_vm9, %vm3047_vm2  ;;  %v731_v5 = vadd.s32 4294967295, %v3311_v18  ;;  %v366_v6 = vadd.s32 24, %v3299_v9  ;;  %v426_v8 = vadd.s32 4294967293, %v3311_v18  ;;  %v2795_v13 = vld [vmem:[%s3271_s18 + $0x30] sm:$0xff]   ;;  %v2806_v54 = vld [vmem:[%s3271_s18 + $0x158] sm:$0xff]  }
  0xa8   : > { %2463 = vmatpush3.bf16.msra.mxu0 %v2774_v15  ;;  %2404 = vmatprep.subr.bf16.mxu1 %v2775_v17  ;;  %v417_v14 = vrot.slane %v3336_v34, 5  ;;  %v998_v18 = vrot.slane %v3319_v23, 1  ;;  %v721_v26 = vrot.slane %v3317_v22, 7  ;;  %v723_v27 = vrot.slane %v3319_v23, 7  ;;  %v2807_v55 = vld [vmem:[%s3271_s18 + $0xa0] sm:$0xff]   ;;  %v2809_v57 = vld [vmem:[%s3271_s18 + $0xa8] sm:$0xff]  }
  0xa9   : > { %2464 = vmatprep.subr.bf16.mxu0 %v2776_v19  ;;  %vm735_vm12 = vcmp.ge.s32.totalorder %v731_v5, 0  ;;  %v3395_v11 = vand.u32 15, %v366_v6  ;;  %vm430_vm14 = vcmp.ge.s32.totalorder %v426_v8, 0  ;;  %vm724_vm15 = vcmp.lt.s32.totalorder %v3299_v9, 1  ;;  %v2810_v58 = vld [vmem:[%s3271_s18 + $0x168] sm:$0xff]   ;;  %v2821_v15 = vld [vmem:[%s3271_s18 + $0x1b0] sm:$0xff]  }
  0xaa   : > { %vm3400_vm13 = vmpackc.low %vm3047_vm2, %vm735_vm12  ;;  %v729_v28 = vadd.s32 4294967295, %v3304_v12  ;;  %v1152_v29 = vrot.slane %v3315_v21, 2  ;;  %v421_v31 = vsel %vm419_vm4, %v416_v43, %v417_v14  ;;  %v1153_v32 = vrot.slane %v3317_v22, 2  ;;  %v2799_v12 = vld [vmem:[%s3271_s18 + $0x80] sm:$0xff]  }
  0xab   : > { %2405 = vmatpush3.bf16.msra.mxu1 %v2775_v17  ;;  %v2797_v17 = vld [vmem:[%s3271_s18 + $0x38] sm:$0xff]   ;;  %v1154_v33 = vrot.slane %v3336_v34, 2  ;;  %v1000_v35 = vsel %vm999_vm6, %v997_v49, %v998_v18  ;;  %vm1156_vm1 = vcmp.lt.s32.totalorder %v3299_v9, 6  ;;  %v1162_v37 = vadd.s32 2, %v3344_v41  ;;  %vm2099_vm5 = vmpackc.low %vm3047_vm2, %vm430_vm14 }
  0xac   : > { %2465 = vmatpush3.bf16.msra.mxu0 %v2776_v19  ;;  %2406 = vmatprep.subr.bf16.mxu1 %v2777_v20  ;;  %v1007_v19 = vadd.s32 1, %v3395_v11  ;;  %v1159_v46 = vsel %vm1156_vm1, %v1152_v29, %v1153_v32  ;;  %v1319_v5 = vadd.s32 3, %v3344_v41 }
  0xad   : > { %2466 = vmatprep.subr.bf16.mxu0 %v2778_v25  ;;  %vm1170_vm8 = vcmp.lt.s32.totalorder %v1162_v37, 16 }
  0xae   : > { %vm1015_vm3 = vcmp.lt.s32.totalorder %v1007_v19, 16  ;;  %vm1327_vm14 = vcmp.lt.s32.totalorder %v1319_v5, 16  ;;  %v2817_v19 = vld [vmem:[%s3271_s18 + $0x190] sm:$0xff]  }
  0xaf   : > { %2407 = vmatpush3.bf16.msra.mxu1 %v2777_v20  ;;  %v1321_v20 = vadd.s32 3, %v3395_v11 }
  0xb0   : > { %2467 = vmatpush3.bf16.msra.mxu0 %v2778_v25  ;;  %2408 = vmatprep.subr.bf16.mxu1 %v2779_v30  ;;  %v720_v25 = vrot.slane %v3315_v21, 7 }
  0xb1   : > { %2468 = vmatprep.subr.bf16.mxu0 %v2780_v36  ;;  %vm1329_vm0 = vcmp.lt.s32.totalorder %v1321_v20, 16  ;;  %v2818_v20 = vld [vmem:[%s3271_s18 + $0x198] sm:$0xff]  }
  0xb2   : > { %v727_v42 = vsel %vm724_vm15, %v720_v25, %v721_v26  ;;  %v728_v43 = vsel %vm724_vm15, %v723_v27, %v720_v25  ;;  %v2820_v25 = vld [vmem:[%s3271_s18 + $0x1a8] sm:$0xff]  }
  0xb3   : > { %2409 = vmatpush3.bf16.msra.mxu1 %v2779_v30  ;;  %v420_v30 = vsel %vm419_vm4, %v417_v14, %v418_v44  ;;  %vm3440_vm4 = vmpackc.low %vm1329_vm0, %vm3047_vm2  ;;  %v2127_v49 = vpack.c.bf16 %v727_v42, %v728_v43 }
  0xb4   : > { %2469 = vmatpush3.bf16.msra.mxu0 %v2780_v36  ;;  %2410 = vmatprep.subr.bf16.mxu1 %v2781_v38  ;;  %v1003_v36 = vsel %vm999_vm6, %v998_v18, %v995_v45  ;;  %v2100_v40 = vpack.c.bf16 %v420_v30, %v421_v31  ;;  %vm733_vm6 = vcmp.ge.s32.totalorder %v729_v28, 0  ;;  %v1158_v45 = vsel %vm1156_vm1, %v1153_v32, %v1154_v33  ;;  %v2816_v18 = vld [vmem:[%s3271_s18 + $0x188] sm:$0xff]   ;;  %vm2240_vm0 = vmpackc.low %vm1327_vm14, %vm3047_vm2 }
  0xb5   : > { %2470 = vmatprep.subr.bf16.mxu0 %v2782_v39  ;;  %v2184_v44 = vpack.c.bf16 %v1003_v36, %v1000_v35  ;;  %vm2126_vm9 = vmpackc.low %vm3047_vm2, %vm733_vm6  ;;  %v2246_v36 = vld [vmem:[%s342_s15] ss:$0 sm:$0xff] }
  0xb7   : > { %2411 = vmatpush3.bf16.msra.mxu1 %v2781_v38  ;;  %v2800_v38 = vld [vmem:[%s3271_s18 + $0x140] sm:$0xff]  }
  0xb8   : > { %2471 = vmatpush3.bf16.msra.mxu0 %v2782_v39  ;;  %2416 = vmatprep.subr.bf16.mxu1 %v2783_v50 }
  0xb9   : > { %2476 = vmatprep.subr.bf16.mxu0 %v2784_v52 }
  0xba   : > { %2413 = vmatmul.mubr.msk.bf16.vlgmr.msra.gmra.mrb[0].mxu1 %vm2085_vm7, %v2086_v53  ;;  %vm2183_vm7 = vmpackc.low %vm1015_vm3, %vm3047_vm2  ;;  %v2805_v53 = vld [vmem:[%s3271_s18 + $0x98] sm:$0xff]  }
  0xbb   : > { %2417 = vmatpush3.bf16.msra.mxu1 %v2783_v50  ;;  %2473 = vmatmul.mubr.bf16.vlgmr.msra.gmra.mrb[0].mxu0 %v361_v56  ;;  %v2211_v50 = vpack.c.bf16 %v1158_v45, %v1159_v46  ;;  %v2808_v56 = vld [vmem:[%s3271_s18 + $0x160] sm:$0xff]  }
  0xbc   : > { %2477 = vmatpush3.bf16.msra.mxu0 %v2784_v52  ;;  %2418 = vmatprep.subr.bf16.mxu1 %v2785_v59  ;;  %v2804_v52 = vld [vmem:[%s3271_s18 + $0x150] sm:$0xff]  }
  0xbd   : > { %2478 = vmatprep.subr.bf16.mxu0 %v2786_v60  ;;  %2432 = vmatprep.mubr.msk.bf16.mxu1 %vm2096_vm10, %v2097_v61  ;;  %vm2210_vm10 = vmpackc.low %vm1170_vm8, %vm3047_vm2  ;;  %v722_v61 = vrot.slane %v3336_v34, 7 }
  0xbe   : > { %2492 = vmatprep.mubr.msk.bf16.mxu0 %vm2180_vm11, %v2181_v62  ;;  %v2813_v62 = vld [vmem:[%s3271_s18 + $0xb8] sm:$0xff]   ;;  %vm1313_vm11 = vcmp.lt.s32.totalorder %v3299_v9, 5 }
  0xbf   : > { %2419 = vmatpush3.bf16.msra.mxu1 %v2785_v59  ;;  %v2811_v59 = vld [vmem:[%s3271_s18 + $0xb0] sm:$0xff]   ;;  %v725_v6 = vsel %vm724_vm15, %v722_v61, %v723_v27  ;;  %v2822_v27 = vld [vmem:[%s3271_s18 + $0x1b8] sm:$0xff]  }
  0xc0   : > { %2479 = vmatpush3.bf16.msra.mxu0 %v2786_v60  ;;  %2420 = vmatprep.subr.bf16.mxu1 %v2787_v63  ;;  %v2812_v60 = vld [vmem:[%s3271_s18 + $0x170] sm:$0xff]  }
  0xc1   : > { %2480 = vmatprep.subr.bf16.mxu0 %v2788_v0 }
  0xc3   : > { %2421 = vmatpush3.bf16.msra.mxu1 %v2787_v63  ;;  %v1155_v63 = vrot.slane %v3319_v23, 2 }
  0xc4   : > { %2481 = vmatpush3.bf16.msra.mxu0 %v2788_v0  ;;  %2422 = vmatprep.subr.bf16.mxu1 %v2789_v1  ;;  %v2814_v0 = vld [vmem:[%s3271_s18 + $0x178] sm:$0xff]  }
  0xc5   : > { %2482 = vmatprep.subr.bf16.mxu0 %v2790_v2  ;;  %v1157_v8 = vsel %vm1156_vm1, %v1154_v33, %v1155_v63  ;;  %v1160_v41 = vsel %vm1156_vm1, %v1155_v63, %v1152_v29  ;;  %vm1509_vm1 = vcmask (!%p2247_p2), 1041408  }
  0xc7   : > { %2423 = vmatpush3.bf16.msra.mxu1 %v2789_v1  ;;  %v1164_v1 = vadd.s32 2, %v3395_v11 }
  0xc8   : > { %2483 = vmatpush3.bf16.msra.mxu0 %v2790_v2  ;;  %2424 = vmatprep.subr.bf16.mxu1 %v2791_v3  ;;  %v1309_v2 = vrot.slane %v3315_v21, 3 }
  0xc9   : > { %2484 = vmatprep.subr.bf16.mxu0 %v2792_v4  ;;  %vm1172_vm12 = vcmp.lt.s32.totalorder %v1164_v1, 16  ;;  %v2831_v1 = vld [vmem:[#allocation8 + $0x40] sm:$0xff] (!%p2247_p2)  }
  0xcb   : > { %2425 = vmatpush3.bf16.msra.mxu1 %v2791_v3  ;;  %v1310_v3 = vrot.slane %v3317_v22, 3 }
  0xcc   : > { %2485 = vmatpush3.bf16.msra.mxu0 %v2792_v4  ;;  %2426 = vmatprep.subr.bf16.mxu1 %v2793_v7  ;;  %v1311_v4 = vrot.slane %v3336_v34, 3 }
  0xcd   : > { %2486 = vmatprep.subr.bf16.mxu0 %v2794_v10 }
  0xce   : > { %v1315_v11 = vsel %vm1313_vm11, %v1310_v3, %v1311_v4 }
  0xcf   : > { %2427 = vmatpush3.bf16.msra.mxu1 %v2793_v7  ;;  %v726_v7 = vsel %vm724_vm15, %v721_v26, %v722_v61  ;;  %vm2213_vm15 = vmpackc.low %vm1172_vm12, %vm3047_vm2  ;;  %v1312_v26 = vrot.slane %v3319_v23, 3  ;;  %vm3049_vm2 = vmmov (!%p2247_p2), 0   ;;  %v2825_v61 = vld [vmem:[#allocation8 + $0x10] sm:$0xff] (!%p2247_p2)  }
  0xd0   : > { %2487 = vmatpush3.bf16.msra.mxu0 %v2794_v10  ;;  %2428 = vmatprep.subr.bf16.mxu1 %v2795_v13  ;;  %v2815_v10 = vld [vmem:[%s3271_s18 + $0x180] sm:$0xff]   ;;  %v2130_v14 = vpack.c.bf16 %v725_v6, %v726_v7 }
  0xd1   : > { %2488 = vmatprep.subr.bf16.mxu0 %v2796_v16  ;;  %v1314_v28 = vsel %vm1313_vm11, %v1311_v4, %v1312_v26  ;;  %v1317_v29 = vsel %vm1313_vm11, %v1312_v26, %v1309_v2  ;;  %v2832_v4 = vld [vmem:[#allocation8 + $0x48] sm:$0xff] (!%p2247_p2)   ;;  %v2827_v7 = vld [vmem:[#allocation8 + $0x20] sm:$0xff] (!%p2247_p2)   ;;  %v2838_v26 = vld [vmem:[#allocation8 + $0x78] sm:$0xff] (!%p2247_p2)  }
  0xd2   : > { %v2244_v30 = vpack.c.bf16 %v1317_v29, %v1314_v28  ;;  %v2840_v28 = vld [vmem:[#allocation8 + $0x88] sm:$0xff] (!%p2247_p2)   ;;  %v2841_v29 = vld [vmem:[#allocation8 + $0x90] sm:$0xff] (!%p2247_p2)  }
  0xd3   : > { %2429 = vmatpush3.bf16.msra.mxu1 %v2795_v13  ;;  %v1316_v13 = vsel %vm1313_vm11, %v1309_v2, %v1310_v3  ;;  %v2826_v2 = vld [vmem:[#allocation8 + $0x18] sm:$0xff] (!%p2247_p2)  }
  0xd4   : > { %2489 = vmatpush3.bf16.msra.mxu0 %v2796_v16  ;;  %2430 = vmatprep.subr.bf16.mxu1 %v2797_v17  ;;  %v2214_v16 = vpack.c.bf16 %v1160_v41, %v1157_v8  ;;  %v2833_v8 = vld [vmem:[#allocation8 + $0x50] sm:$0xff] (!%p2247_p2)  }
  0xd5   : > { %2490 = vmatprep.subr.bf16.mxu0 %v2798_v24 }
  0xd7   : > { %2431 = vmatpush3.bf16.msra.mxu1 %v2797_v17  ;;  %v2241_v17 = vpack.c.bf16 %v1315_v11, %v1316_v13  ;;  %v2828_v11 = vld [vmem:[#allocation8 + $0x28] sm:$0xff] (!%p2247_p2)   ;;  %v2834_v13 = vld [vmem:[#allocation8 + $0x58] sm:$0xff] (!%p2247_p2)  }
  0xd8   : > { %2491 = vmatpush3.bf16.msra.mxu0 %v2798_v24  ;;  %2436 = vmatprep.subr.bf16.mxu1 %v2799_v12  ;;  %v2819_v24 = vld [vmem:[%s3271_s18 + $0x1a0] sm:$0xff]  }
  0xd9   : > { %2496 = vmatprep.subr.bf16.mxu0 %v2800_v38 }
  0xda   : > { %2433 = vmatmul.mubr.msk.bf16.vlgmr.msra.gmra.mrb[0].mxu1 %vm2099_vm5, %v2100_v40 }
  0xdb   : > { %2437 = vmatpush3.bf16.msra.mxu1 %v2799_v12  ;;  %2493 = vmatmul.mubr.msk.bf16.vlgmr.msra.gmra.mrb[0].mxu0 %vm2183_vm7, %v2184_v44 }
  0xdc   : > { %2497 = vmatpush3.bf16.msra.mxu0 %v2800_v38  ;;  %2438 = vmatprep.subr.bf16.mxu1 %v2801_v47 }
  0xdd   : > { %2498 = vmatprep.subr.bf16.mxu0 %v2802_v48  ;;  %2452 = vmatprep.mubr.msk.bf16.mxu1 %vm2126_vm9, %v2127_v49 }
  0xde   : > { %2512 = vmatprep.mubr.msk.bf16.mxu0 %vm2210_vm10, %v2211_v50 }
  0xdf   : > { %2439 = vmatpush3.bf16.msra.mxu1 %v2801_v47 }
  0xe0   : > { %2499 = vmatpush3.bf16.msra.mxu0 %v2802_v48  ;;  %2440 = vmatprep.subr.bf16.mxu1 %v2803_v51 }
  0xe1   : > { %2500 = vmatprep.subr.bf16.mxu0 %v2804_v52 }
  0xe3   : > { %2441 = vmatpush3.bf16.msra.mxu1 %v2803_v51 }
  0xe4   : > { %2501 = vmatpush3.bf16.msra.mxu0 %v2804_v52  ;;  %2442 = vmatprep.subr.bf16.mxu1 %v2805_v53 }
  0xe5   : > { %2502 = vmatprep.subr.bf16.mxu0 %v2806_v54 }
  0xe7   : > { %2443 = vmatpush3.bf16.msra.mxu1 %v2805_v53 }
  0xe8   : > { %2503 = vmatpush3.bf16.msra.mxu0 %v2806_v54  ;;  %2444 = vmatprep.subr.bf16.mxu1 %v2807_v55 }
  0xe9   : > { %2504 = vmatprep.subr.bf16.mxu0 %v2808_v56 }
  0xeb   : > { %2445 = vmatpush3.bf16.msra.mxu1 %v2807_v55 }
  0xec   : > { %2505 = vmatpush3.bf16.msra.mxu0 %v2808_v56  ;;  %2446 = vmatprep.subr.bf16.mxu1 %v2809_v57  ;;  %v2823_v56 = vld [vmem:[#allocation8] sm:$0xff] (!%p2247_p2)  }
  0xed   : > { %2506 = vmatprep.subr.bf16.mxu0 %v2810_v58 }
  0xef   : > { %2447 = vmatpush3.bf16.msra.mxu1 %v2809_v57 }
  0xf0   : > { %2507 = vmatpush3.bf16.msra.mxu0 %v2810_v58  ;;  %2448 = vmatprep.subr.bf16.mxu1 %v2811_v59 }
  0xf1   : > { %2508 = vmatprep.subr.bf16.mxu0 %v2812_v60 }
  0xf3   : > { %2449 = vmatpush3.bf16.msra.mxu1 %v2811_v59  ;;  %v3048_v59 = vmov (!%p2247_p2), 0.0  }
  0xf4   : > { %2509 = vmatpush3.bf16.msra.mxu0 %v2812_v60  ;;  %2450 = vmatprep.subr.bf16.mxu1 %v2813_v62 }
  0xf5   : > { %2510 = vmatprep.subr.bf16.mxu0 %v2814_v0 }
  0xf7   : > { %2451 = vmatpush3.bf16.msra.mxu1 %v2813_v62 }
  0xf8   : > { %2511 = vmatpush3.bf16.msra.mxu0 %v2814_v0  ;;  %2556 = vmatprep.subr.bf16.mxu1 (!%p2247_p2), %v3048_v59 }
  0xf9   : > { %2516 = vmatprep.subr.bf16.mxu0 %v2815_v10 }
  0xfa   : > { %2453 = vmatmul.mubr.msk.bf16.vlgmr.msra.gmra.mrb[0].mxu1 %vm3400_vm13, %v2130_v14  ;;  %vm1507_vm13 = vcmask (!%p2247_p2), 1040384  }
  0xfb   : > { %2513 = vmatmul.mubr.msk.bf16.vlgmr.msra.gmra.mrb[0].mxu0 %vm2213_vm15, %v2214_v16  ;;  %2572 = vmatprep.mubr.msk.bf16.mxu1 (!%p2247_p2), %vm3049_vm2, %v3048_v59  ;;  %v2829_v16 = vld [vmem:[#allocation8 + $0x30] sm:$0xff] (!%p2247_p2)  }
  0xfc   : > { %2517 = vmatpush3.bf16.msra.mxu0 %v2815_v10  ;;  %2532 = vmatprep.mubr.msk.bf16.mxu0 %vm2240_vm0, %v2241_v17 }
  0xfd   : > { %2518 = vmatprep.subr.bf16.mxu0 %v2816_v18  ;;  %2557 = vmatpush3.bf16.msra.mxu1 (!%p2247_p2), %v2831_v1 }
  0xfe   : > { %2558 = vmatprep.subr.bf16.mxu1 (!%p2247_p2), %v3048_v59 }
 0x100   : > { %2519 = vmatpush3.bf16.msra.mxu0 %v2816_v18  ;;  %v2835_v18 = vld [vmem:[#allocation8 + $0x60] sm:$0xff] (!%p2247_p2)  }
 0x101   : > { %2520 = vmatprep.subr.bf16.mxu0 %v2817_v19  ;;  %2559 = vmatpush3.bf16.msra.mxu1 (!%p2247_p2), %v2832_v4 }
 0x102   : > { %2560 = vmatprep.subr.bf16.mxu1 (!%p2247_p2), %v3048_v59 }
 0x104   : > { %2521 = vmatpush3.bf16.msra.mxu0 %v2817_v19 }
 0x105   : > { %2522 = vmatprep.subr.bf16.mxu0 %v2818_v20  ;;  %2561 = vmatpush3.bf16.msra.mxu1 (!%p2247_p2), %v2833_v8  ;;  %v2268_v8 = vld [vmem:[%s3620_s4 + $0x2] ss:$0 sm:$0xff] (!%p2247_p2) }
 0x106   : > { %2562 = vmatprep.subr.bf16.mxu1 (!%p2247_p2), %v3048_v59 }
 0x108   : > { %2523 = vmatpush3.bf16.msra.mxu0 %v2818_v20  ;;  %v2830_v20 = vld [vmem:[#allocation8 + $0x38] sm:$0xff] (!%p2247_p2)  }
 0x109   : > { %2524 = vmatprep.subr.bf16.mxu0 %v2819_v24  ;;  %2563 = vmatpush3.bf16.msra.mxu1 (!%p2247_p2), %v2834_v13 }
 0x10a   : > { %2564 = vmatprep.subr.bf16.mxu1 (!%p2247_p2), %v3048_v59 }
 0x10c   : > { %2525 = vmatpush3.bf16.msra.mxu0 %v2819_v24  ;;  %v2836_v24 = vld [vmem:[#allocation8 + $0x68] sm:$0xff] (!%p2247_p2)  }
 0x10d   : > { %2526 = vmatprep.subr.bf16.mxu0 %v2820_v25  ;;  %2565 = vmatpush3.bf16.msra.mxu1 (!%p2247_p2), %v2835_v18 }
 0x10e   : > { %2566 = vmatprep.subr.bf16.mxu1 (!%p2247_p2), %v3048_v59 }
 0x110   : > { %2527 = vmatpush3.bf16.msra.mxu0 %v2820_v25 }
 0x111   : > { %2528 = vmatprep.subr.bf16.mxu0 %v2821_v15  ;;  %2567 = vmatpush3.bf16.msra.mxu1 (!%p2247_p2), %v2836_v24 }
 0x112   : > { %2568 = vmatprep.subr.bf16.mxu1 (!%p2247_p2), %v3048_v59 }
 0x114   : > { %2529 = vmatpush3.bf16.msra.mxu0 %v2821_v15  ;;  %v2837_v15 = vld [vmem:[#allocation8 + $0x70] sm:$0xff] (!%p2247_p2)  }
 0x115   : > { %2530 = vmatprep.subr.bf16.mxu0 %v2822_v27  ;;  %2569 = vmatpush3.bf16.msra.mxu1 (!%p2247_p2), %v2837_v15 }
 0x116   : > { %2570 = vmatprep.subr.bf16.mxu1 (!%p2247_p2), %v3048_v59 }
 0x118   : > { %2531 = vmatpush3.bf16.msra.mxu0 %v2822_v27  ;;  %v2839_v27 = vld [vmem:[#allocation8 + $0x80] sm:$0xff] (!%p2247_p2)  }
 0x119   : > { %2536 = vmatprep.subr.bf16.mxu0 (!%p2247_p2), %v3048_v59  ;;  %2571 = vmatpush3.bf16.msra.mxu1 (!%p2247_p2), %v2838_v26 }
 0x11b   : > { %2533 = vmatmul.mubr.msk.bf16.vlgmr.msra.gmra.mrb[0].mxu0 %vm3440_vm4, %v2244_v30  ;;  %v2842_v30 = vld [vmem:[#allocation8 + $0x98] sm:$0xff] (!%p2247_p2)  }
 0x11c   : > { %2537 = vmatpush3.bf16.msra.mxu0 (!%p2247_p2), %v2823_v56  ;;  %2552 = vmatprep.mubr.msk.bf16.mxu0 (!%p2247_p2), %vm3049_vm2, %v3048_v59  ;;  %v1863_v56 = vld [vmem:[#allocation9 + $0x40] sm:$0xff] (!%p2247_p2) }
 0x11d   : > { %2538 = vmatprep.subr.bf16.mxu0 (!%p2247_p2), %v3048_v59 }
 0x1cd   : > { %v2454_v31 = vpop.f32.mrb[0].mxu1 }
 0x1ce   : > { %v858_v32 = vpop.f32.mrb[1].mxu1 }
 0x1cf   : > { %v2455_v33 = vpop.f32.mrb[2].mxu1 }
 0x1d0   : > { %v861_v12 = vpop.f32.mrb[3].mxu1 }
 0x1ee   : > { %v2534_v35 = vpop.f32.mrb[0].mxu0 }
 0x1ef   : > { %v2655_v37 = vadd.f32 %v2534_v35, %v2454_v31  ;;  %v1447_v38 = vpop.f32.mrb[1].mxu0  ;;  %v2843_v31 = vld [vmem:[#allocation8 + $0xa0] sm:$0xff] (!%p2247_p2)  }
 0x1f0   : > { %v2656_v9 = vadd.f32 %v1447_v38, %v858_v32  ;;  %v2535_v40 = vpop.f32.mrb[2].mxu0  ;;  %v2844_v32 = vld [vmem:[#allocation8 + $0xa8] sm:$0xff] (!%p2247_p2)  }
 0x1f1   : > { %v1475_v42 = vadd.f32 %v2655_v37, %v2246_v36  ;;  %v2657_v43 = vadd.f32 %v2535_v40, %v2455_v33  ;;  %v1450_v44 = vpop.f32.mrb[3].mxu0  ;;  %v2248_v33 = vld [vmem:[%s3620_s4] ss:$0 sm:$0xff] (!%p2247_p2) }
 0x1f2   : > { %v1473_v45 = vadd.f32 %v2656_v9, %v2246_v36  ;;  %v2658_v39 = vadd.f32 %v1450_v44, %v861_v12  ;;  %v1855_v44 = vld [vmem:[#allocation9] sm:$0xff] (!%p2247_p2) }
 0x1f3   : > { %v1479_v46 = vmax.f32 %v1475_v42, 0.0  ;;  %v1476_v47 = vadd.f32 %v2657_v43, %v2246_v36  ;;  %v2845_v42 = vld [vmem:[#allocation8 + $0xb0] sm:$0xff] (!%p2247_p2)   ;;  %v2846_v43 = vld [vmem:[#allocation8 + $0xb8] sm:$0xff] (!%p2247_p2)  }
 0x1f4   : > { %v1477_v48 = vmax.f32 %v1473_v45, 0.0  ;;  %v1474_v49 = vadd.f32 %v2658_v39, %v2246_v36  ;;  %1492 = sbr.rel (%p2247_p2) target bundleno = 1397 (0x575), region = 72  ;;  %v1856_v45 = vld [vmem:[#allocation9 + $0x8] sm:$0xff] (!%p2247_p2)  ;;  %v1857_v39 = vld [vmem:[#allocation9 + $0x10] sm:$0xff] (!%p2247_p2) }
 0x1f5   : > { %v1483_v50 = vadd.f32 %v1479_v46, %v3336_v34  ;;  %v1480_v51 = vmax.f32 %v1476_v47, 0.0  ;;  %v3050_v46 = vmov (!%p2247_p2), 0.0|0.0   ;;  %v2632_v47 = vpack.c.bf16 (!%p2247_p2), %v1856_v45, %v1855_v44 }
 0x1f6   : > { %v1481_v52 = vadd.f32 %v1477_v48, %v3315_v21  ;;  %v1478_v53 = vmax.f32 %v1474_v49, 0.0  ;;  %v2824_v21 = vld [vmem:[#allocation8 + $0x8] sm:$0xff] (!%p2247_p2)   ;;  %2631 = vmatprep.subr.bf16.mxu1 (!%p2247_p2), %v3050_v46  ;;  %v1858_v48 = vld [vmem:[#allocation9 + $0x18] sm:$0xff] (!%p2247_p2) }
 0x1f7   : > { %1487 = vst [vmem:[#allocation2 + $0x10] sm:$0xff] %v1483_v50  ;;  %v1484_v54 = vadd.f32 %v1480_v51, %v3319_v23  ;;  %2539 = vmatpush3.bf16.msra.mxu0 (!%p2247_p2), %v2824_v21  ;;  %v2635_v49 = vpack.c.bf16 (!%p2247_p2), %v1858_v48, %v1857_v39  ;;  %v1860_v51 = vld [vmem:[#allocation9 + $0x28] sm:$0xff] (!%p2247_p2)  ;;  %v1866_v21 = vld [vmem:[#allocation9 + $0x58] sm:$0xff] (!%p2247_p2) }
 0x1f8   : > { %1485 = vst [vmem:[#allocation2] sm:$0xff] %v1481_v52  ;;  %v1482_v55 = vadd.f32 %v1478_v53, %v3317_v22  ;;  %2540 = vmatprep.subr.bf16.mxu0 (!%p2247_p2), %v3048_v59  ;;  %v1861_v53 = vld [vmem:[#allocation9 + $0x30] sm:$0xff] (!%p2247_p2) }
 0x1f9   : > { %1488 = vst [vmem:[#allocation2 + $0x18] sm:$0xff] %v1484_v54  ;;  %v1500_v58 = vadd.f32 (!%p2247_p2), %v1484_v54, %v1483_v50  ;;  %v1859_v50 = vld [vmem:[#allocation9 + $0x20] sm:$0xff] (!%p2247_p2)  ;;  %v1862_v54 = vld [vmem:[#allocation9 + $0x38] sm:$0xff] (!%p2247_p2) }
 0x1fa   : > { %1486 = vst [vmem:[#allocation2 + $0x8] sm:$0xff] %v1482_v55  ;;  %v1493_v57 = vadd.f32 (!%p2247_p2), %v1482_v55, %v1481_v52  ;;  %v2638_v52 = vpack.c.bf16 (!%p2247_p2), %v1860_v51, %v1859_v50  ;;  %v2641_v55 = vpack.c.bf16 (!%p2247_p2), %v1862_v54, %v1861_v53 }
 0x1fb   : > { %v1501_v23 = vrot.slane %v1500_v58, 4  ;;  %2541 = vmatpush3.bf16.msra.mxu0 %v2825_v61  ;;  %v2258_v61 = vld [vmem:[%s3620_s4 + $0x1] ss:$0 sm:$0xff] }
 0x1fc   : > { %v1494_v22 = vrot.slane %v1493_v57, 4  ;;  %2542 = vmatprep.subr.bf16.mxu0 %v3048_v59 }
 0x1fd   : > { %v1502_v60 = vadd.f32 %v1501_v23, %v1500_v58  ;;  %v1867_v23 = vld [vmem:[#allocation9 + $0x60] sm:$0xff] }
 0x1fe   : > { %v1495_v34 = vadd.f32 %v1494_v22, %v1493_v57  ;;  %v1864_v57 = vld [vmem:[#allocation9 + $0x48] sm:$0xff] }
 0x1ff   : > { %v1503_v63 = vrot.slane %v1502_v60, 2  ;;  %2543 = vmatpush3.bf16.msra.mxu0 %v2826_v2  ;;  %v2644_v58 = vpack.c.bf16 %v1864_v57, %v1863_v56 }
 0x200   : > { %v1496_v62 = vrot.slane %v1495_v34, 2  ;;  %2544 = vmatprep.subr.bf16.mxu0 %v3048_v59 }
 0x201   : > { %v1504_v3 = vadd.f32 %v1503_v63, %v1502_v60 }
 0x202   : > { %v1497_v0 = vadd.f32 %v1496_v62, %v1495_v34  ;;  %v1868_v34 = vld [vmem:[#allocation9 + $0x68] sm:$0xff] }
 0x203   : > { %v1505_v6 = vrot.slane %v1504_v3, 1  ;;  %2545 = vmatpush3.bf16.msra.mxu0 %v2827_v7  ;;  %v2650_v60 = vpack.c.bf16 %v1868_v34, %v1867_v23 }
 0x204   : > { %v1498_v5 = vrot.slane %v1497_v0, 1  ;;  %2546 = vmatprep.subr.bf16.mxu0 %v3048_v59 }
 0x205   : > { %v1506_v10 = vadd.f32 %v1505_v6, %v1504_v3  ;;  %v1870_v6 = vld [vmem:[#allocation9 + $0x78] sm:$0xff] }
 0x206   : > { %v1499_v41 = vadd.f32 %v1498_v5, %v1497_v0  ;;  %v1869_v5 = vld [vmem:[#allocation9 + $0x70] sm:$0xff] }
 0x207   : > { %2547 = vmatpush3.bf16.msra.mxu0 %v2828_v11  ;;  %v2653_v7 = vpack.c.bf16 %v1870_v6, %v1869_v5 }
 0x208   : > { %v1508_v14 = vsel %vm1507_vm13, %v1499_v41, %v1506_v10  ;;  %2548 = vmatprep.subr.bf16.mxu0 %v3048_v59 }
 0x209   : > { %v1510_v17 = vsel %vm1509_vm1, %v1508_v14, 0.0 }
 0x20a   : > { %v1511_v19 = vmul.f32 0.0625, %v1510_v17  ;;  %v2277_v17 = vld [vmem:[%s3622_s6] ss:$0 sm:$0xff] }
 0x20b   : > { %2549 = vmatpush3.bf16.msra.mxu0 %v2829_v16 }
 0x20c   : > { %2550 = vmatprep.subr.bf16.mxu0 %v3048_v59  ;;  %v1512_v25 = vpack.c.bf16 %v1511_v19, %v1511_v19 }
 0x20f   : > { %2551 = vmatpush3.bf16.msra.mxu0 %v2830_v20 }
 0x210   : > { %2576 = vmatprep.subr.bf16.mxu0 %v3048_v59 }
 0x212   : > { %2553 = vmatmul.mubr.bf16.vlgmr.msra.gmra.mrb[0].mxu0 %v1512_v25 }
 0x213   : > { %2592 = vmatprep.mubr.msk.bf16.mxu0 %vm3049_vm2, %v3048_v59  ;;  %2577 = vmatpush3.bf16.msra.mxu0 %v2839_v27 }
 0x214   : > { %2578 = vmatprep.subr.bf16.mxu0 %v3048_v59 }
 0x217   : > { %2579 = vmatpush3.bf16.msra.mxu0 %v2840_v28 }
 0x218   : > { %2580 = vmatprep.subr.bf16.mxu0 %v3048_v59 }
 0x21b   : > { %2581 = vmatpush3.bf16.msra.mxu0 %v2841_v29 }
 0x21c   : > { %2582 = vmatprep.subr.bf16.mxu0 %v3048_v59 }
 0x21f   : > { %2583 = vmatpush3.bf16.msra.mxu0 %v2842_v30 }
 0x220   : > { %2584 = vmatprep.subr.bf16.mxu0 %v3048_v59 }
 0x223   : > { %2585 = vmatpush3.bf16.msra.mxu0 %v2843_v31 }
 0x224   : > { %2586 = vmatprep.subr.bf16.mxu0 %v3048_v59 }
 0x227   : > { %2587 = vmatpush3.bf16.msra.mxu0 %v2844_v32 }
 0x228   : > { %2588 = vmatprep.subr.bf16.mxu0 %v3048_v59 }
 0x22b   : > { %2589 = vmatpush3.bf16.msra.mxu0 %v2845_v42 }
 0x22c   : > { %2590 = vmatprep.subr.bf16.mxu0 %v3048_v59 }
 0x22f   : > { %2591 = vmatpush3.bf16.msra.mxu0 %v2846_v43 }
 0x2e5   : > { %v1618_v12 = vpop.f32.mrb[0].mxu0 }
 0x2e6   : > { %v1619_v35 = vadd.f32 %v2248_v33, %v1618_v12  ;;  %v2554_v36 = vpop.f32.mrb[1].mxu0 }
 0x2e7   : > { %v1621_v37 = vpop.f32.mrb[2].mxu0 }
 0x2e8   : > { %v1624_v38 = vmax.f32 %v1619_v35, 0.0  ;;  %v2555_v9 = vpop.f32.mrb[3].mxu0 }
 0x2ea   : > { %v1625_v40 = vpack.c.bf16 %v1624_v38, %v1624_v38 }
 0x2ec   : > { %2573 = vmatmul.mubr.bf16.vlgmr.msra.gmra.mrb[0].mxu1 %v1625_v40 }
 0x2ed   : > { %2628 = vmatprep.mubr.msk.f32.mxu1 %vm3049_vm2, %v3048_v59  ;;  %2633 = vmatpush3.bf16.msra.mxu1 %v2632_v47  ;;  %v1865_v59 = vld [vmem:[#allocation9 + $0x50] sm:$0xff] }
 0x2ee   : > { %2634 = vmatprep.subr.bf16.mxu1 %v3050_v46  ;;  %v2647_v22 = vpack.c.bf16 %v1866_v21, %v1865_v59 }
 0x2f1   : > { %2636 = vmatpush3.bf16.msra.mxu1 %v2635_v49 }
 0x2f2   : > { %2637 = vmatprep.subr.bf16.mxu1 %v3050_v46 }
 0x2f5   : > { %2639 = vmatpush3.bf16.msra.mxu1 %v2638_v52 }
 0x2f6   : > { %2640 = vmatprep.subr.bf16.mxu1 %v3050_v46 }
 0x2f9   : > { %2642 = vmatpush3.bf16.msra.mxu1 %v2641_v55 }
 0x2fa   : > { %2643 = vmatprep.subr.bf16.mxu1 %v3050_v46 }
 0x2fd   : > { %2645 = vmatpush3.bf16.msra.mxu1 %v2644_v58 }
 0x2fe   : > { %2646 = vmatprep.subr.bf16.mxu1 %v3050_v46 }
 0x301   : > { %2648 = vmatpush3.bf16.msra.mxu1 %v2647_v22 }
 0x302   : > { %2649 = vmatprep.subr.bf16.mxu1 %v3050_v46 }
 0x305   : > { %2651 = vmatpush3.bf16.msra.mxu1 %v2650_v60 }
 0x306   : > { %2652 = vmatprep.subr.bf16.mxu1 %v3050_v46 }
 0x309   : > { %2654 = vmatpush3.bf16.msra.mxu1 %v2653_v7 }
 0x3bf   : > { %v1733_v62 = vpop.f32.mrb[0].mxu1 }
 0x3c0   : > { %v1734_v63 = vadd.f32 %v2258_v61, %v1733_v62  ;;  %v2574_v0 = vpop.f32.mrb[1].mxu1 }
 0x3c1   : > { %v1736_v1 = vpop.f32.mrb[2].mxu1 }
 0x3c2   : > { %v1739_v2 = vmax.f32 %v1734_v63, 0.0  ;;  %v2575_v3 = vpop.f32.mrb[3].mxu1 }
 0x3c4   : > { %v1740_v4 = vpack.c.bf16 %v1739_v2, %v1739_v2 }
 0x3c6   : > { %2593 = vmatmul.mubr.bf16.vlgmr.msra.gmra.mrb[4].mxu0 %v1740_v4 }
 0x499   : > { %v1848_v41 = vpop.f32.mrb[4].mxu0 }
 0x49a   : > { %v1849_v10 = vadd.f32 %v2268_v8, %v1848_v41  ;;  %v2594_v11 = vpop.f32.mrb[5].mxu0 }
 0x49b   : > { %v1851_v13 = vpop.f32.mrb[6].mxu0 }
 0x49c   : > { %v1854_v14 = vmax.f32 %v1849_v10, 0.0  ;;  %v2595_v16 = vpop.f32.mrb[7].mxu0 }
 0x49e   : > { %2629 = vmatmul.mubr.f32.vlgmr.msra.gmra.mrb[4].mxu1 %v1854_v14 }
 0x571   : > { %v1944_v18 = vpop.f32.mrb[4].mxu1 }
 0x572   : > { %v1945_v19 = vadd.f32 %v2277_v17, %v1944_v18  ;;  %v2630_v20 = vpop.f32.mrb[5].mxu1 }
 0x574   : > { %1948 = vst [vmem:[#allocation11] sm:$0xff] %v1945_v19 }
 0x575 PF: > { %p2721_p8 = scmp.eq.s32.totalorder %s3111_s28, 2  ;;  %s3051_s8 = smov [#allocation11]  }
 0x576   : > { %s1956_s10 = sshll.u32 %s3051_s8, 4  ;;  %s1957_s10 = int_to_ptr.vmem [resolvable:$true] %s1956_s10 }
 0x577   : > { %s2961_s3 = scalar_lea.vmem %s1957_s10, 128  ;;  %p2968_p9 = scmp.lt.s32.totalorder %s1957_s10, %s1957_s10 }
 0x578   : > { %p2962_p10 = scmp.ne.s32.totalorder %s1957_s10, %s2961_s3  ;;  %p2969_p1 = scmp.lt.s32.totalorder %s2961_s3, %s2961_s3 }
 0x57a   : > { %p2963_p0 = pnand %p2962_p10, %p2721_p8  ;;  %p2970_p3 = por %p2969_p1, %p2968_p9 }
 0x57c   : > { %p2964_p5 = pneg %p2963_p0 }
 0x57e   : > { %p2971_p12 = pnand %p2970_p3, %p2964_p5 }
 0x580   : > { %2974 = shalt.err (!%p2971_p12)
}
 0x581   : > { %s3660_s9 = sld [smem:[#allocation20_spill]] }
 0x587   : > { %s2975_s22 = scalar_lea.hbm %s3660_s9, 128 }
 0x588   : > { %p2976_p4 = scmp.ne.s32.totalorder %s3660_s9, %s2975_s22  ;;  %p2981_p11 = scmp.lt.u32.totalorder %s2975_s22, %s3660_s9 }
 0x58a   : > { %p2977_p6 = pnand %p2976_p4, %p2721_p8 }
 0x58c   : > { %p2978_p7 = pneg %p2977_p6 }
 0x58e   : > { %p2983_p13 = pnand %p2981_p11, %p2978_p7 }
 0x590   : > { %2986 = shalt.err (!%p2983_p13)
}
 0x591   : > { %2697 = dma.vmem_to_hbm [thread:$0]  (%p2721_p8), %s1957_s10, 128, %s3660_s9, [#allocation5]  }
 0x592   : > { %3020 = dma.done.wait (%p2721_p8), [#allocation5], 128  }
 0x593   : > { %3022 = vsyncadd (%p2721_p8), [#allocation5], 4294967168 }
 0x594 PF: > { %s3661_s27 = sld [smem:[#allocation17_spill]]  ;;  %s3662_s30 = sld [smem:[#allocation18_spill]] }
 0x595   : > { %s3663_s24 = smov %s3029_s25  ;;  %s3664_s25 = smov %s3033_s26 }
 0x59a   : > { %p20_p2 = scmp.ge.s32.totalorder %s3661_s27, 5   ;;  %s3665_s26 = smov %s3662_s30 }
 0x59c   :  { %22 = sbr.rel (!%p20_p2) target bundleno = 9 (0x9), region = 119 }
 0x5a3   :  { %1969 = vsyncpa [#allocation4], 1 }
 0x5a4   :  { %1971 = vsyncpa [#allocation4 + $0x1], 1 }
 0x5a5   :  { %1972 = vsyncpa [#allocation7], 1 }
 0x5a6   :  { %1974 = vsyncpa [#allocation7 + $0x1], 1 }
 0x5a7   :  { %1975 = vsyncpa [#allocation10], 1 }
 0x5a8   :  { %1976 = vsyncpa [#allocation5], 1 }
 0x5a9   :  { %1978 = vsyncpa [#allocation5 + $0x1], 1 }

</bundles_post_ra>
